<compile_context>
chip_gen: v7x
topology: tpu7x:2x2x1
jax: 0.10.0
libtpu: 0.0.40
codegen_flags: <defaults>
</compile_context>

<pallas_src>
import jax
import jax.numpy as jnp
from jax import lax
from jax.experimental import pallas as pl
from jax.experimental.pallas import tpu as pltpu


def _lstm_peep_kernel(x_ref, wx_ref, bx_ref, whc_ref, wco_ref,
                      h_out_ref, c_out_ref, xp_ref):
    """Peephole-LSTM recurrence, fully VMEM-resident, single grid-less invocation.

    x_ref   : (T, B, C)  f32   inputs, time-major
    wx_ref  : (C, 4H)    bf16  fused input weights, gate order [i | f | g | o]
    bx_ref  : (1, 4H)    f32   fused gate biases
    whc_ref : (2H, 4H)   bf16  fused recurrent + old-cell-peephole weights:
                               rows [0:H)  = Wh  (h -> all four gates)
                               rows [H:2H) = [Wc_i | Wc_f | 0 | 0] (old c -> i, f only)
    wco_ref : (H, H)     bf16  peephole of the NEW cell state c_t on the o gate
    h_out_ref, c_out_ref : (T, B, H) f32 per-step outputs
    xp_ref  : (T, B, 4H) f32   VMEM scratch for the input pre-activations
    """
    T, B, C = x_ref.shape
    H = wco_ref.shape[0]

    # -- Prologue: hoisted input projection — ONE lane-dense MXU matmul for all steps.
    #    (T,B,C) -> (T*B,C) is a pure leading-dim collapse (B equals the native sublane
    #    count), so the reshape is layout-compatible.
    x2d = x_ref[...].reshape(T * B, C).astype(jnp.bfloat16)
    xp = jnp.dot(x2d, wx_ref[...], preferred_element_type=jnp.float32) + bx_ref[...]
    xp_ref[...] = xp.reshape(T, B, 4 * H)

    # Weights loaded once; resident for the whole recurrence.
    whc = whc_ref[...]
    wco = wco_ref[...]

    def step(t, carry):
        h, c = carry
        # Packed state -> ONE full-width (B,2H)x(2H,4H=128) matmul covers the h
        # recurrence of all four gates plus the old-cell peephole on i/f.
        hc = jnp.concatenate([h, c], axis=-1).astype(jnp.bfloat16)
        rec = xp_ref[t] + jnp.dot(hc, whc, preferred_element_type=jnp.float32)

        i_t = jax.nn.sigmoid(rec[:, 0:H])
        f_t = jax.nn.sigmoid(rec[:, H:2 * H])
        g_t = jnp.tanh(rec[:, 2 * H:3 * H])
        c_t = f_t * c + i_t * g_t
        # Output gate peeps at the NEW cell state c_t.
        o_t = jax.nn.sigmoid(
            rec[:, 3 * H:4 * H]
            + jnp.dot(c_t.astype(jnp.bfloat16), wco,
                      preferred_element_type=jnp.float32))
        h_t = o_t * jnp.tanh(c_t)

        # Stores are off the h->h critical path (hidden under the next step's matmul).
        h_out_ref[t] = h_t
        c_out_ref[t] = c_t
        return h_t, c_t

    h0 = jnp.zeros((B, H), jnp.float32)
    c0 = jnp.zeros((B, H), jnp.float32)
    # Small static T: full unroll gives the LLO scheduler the entire recurrence.
    # (Cap the unroll factor instead of unroll=True once T grows large.)
    h_last, c_last = lax.fori_loop(0, T, step, (h0, c0), unroll=True)
    # Consume the final carry explicitly (data-wise a no-op: re-writes step T-1's
    # values) so the loop's liveness does not rest solely on tracked ref effects.
    h_out_ref[T - 1] = h_last
    c_out_ref[T - 1] = c_last


def prepare_lstm_params(fc1_w, fc1_b, fc2_w, fc2_b, fc3_w, fc3_b, in_c, hid_c):
    """One-time fusion of the three PyTorch-style Linear layers into kernel weights.

    Gate/column order is [i | f | g | o].  Runs OUTSIDE the per-call jitted forward so
    these slice/concat/cast HLOs never appear on the forward dispatch path.
    """
    C, H = in_c, hid_c
    w1t = fc1_w.T            # (C + 2H, 2H)  columns: [i | f],  rows: [x | h | c]
    w2t = fc2_w.T            # (C + 2H, H)   -> o gate,         rows: [x | h | c_t]
    w3t = fc3_w.T            # (C + H,  H)   -> g gate,         rows: [x | h]

    wx = jnp.concatenate([w1t[:C, :H], w1t[:C, H:], w3t[:C], w2t[:C]], axis=1)    # (C,4H)
    bx = jnp.concatenate([fc1_b[:H], fc1_b[H:], fc3_b, fc2_b]).reshape(1, 4 * H)  # (1,4H)

    wh = jnp.concatenate(
        [w1t[C:C + H, :H], w1t[C:C + H, H:], w3t[C:], w2t[C:C + H]], axis=1)      # (H,4H)
    zeros = jnp.zeros((H, H), wh.dtype)
    wc = jnp.concatenate(
        [w1t[C + H:, :H], w1t[C + H:, H:], zeros, zeros], axis=1)                 # (H,4H)
    whc = jnp.concatenate([wh, wc], axis=0)                                       # (2H,4H)
    wco = w2t[C + H:]                                                             # (H,H)

    # bf16 MXU operands (f32 accumulation in-kernel); bias stays f32.
    return (wx.astype(jnp.bfloat16), bx.astype(jnp.float32),
            whc.astype(jnp.bfloat16), wco.astype(jnp.bfloat16))


@jax.jit
def lstm_cell_peep_forward(x_btc, wx, bx, whc, wco):
    """x_btc: (B, T, in_c).  Returns (hs, cs), each (B, T, H) — per-step states."""
    B, T, C = x_btc.shape
    H = wco.shape[0]
    x_tbc = jnp.transpose(x_btc, (1, 0, 2)).astype(jnp.float32)   # (T, B, C)

    vmem = pl.BlockSpec(memory_space=pltpu.MemorySpace.VMEM)
    hs_tbh, cs_tbh = pl.pallas_call(
        _lstm_peep_kernel,
        out_shape=(jax.ShapeDtypeStruct((T, B, H), jnp.float32),
                   jax.ShapeDtypeStruct((T, B, H), jnp.float32)),
        in_specs=[vmem, vmem, vmem, vmem, vmem],
        out_specs=(vmem, vmem),
        scratch_shapes=[pltpu.VMEM((T, B, 4 * H), jnp.float32)],
    )(x_tbc, wx, bx, whc, wco)

    return jnp.transpose(hs_tbh, (1, 0, 2)), jnp.transpose(cs_tbh, (1, 0, 2))


def _reference(x_btc, fc1_w, fc1_b, fc2_w, fc2_b, fc3_w, fc3_b, H):
    """Exact-f32 reference of the modeled (FC-gate) peephole LSTM."""
    hi = jax.lax.Precision.HIGHEST
    B, T, C = x_btc.shape
    h = jnp.zeros((B, H), jnp.float32)
    c = jnp.zeros((B, H), jnp.float32)
    hs, cs = [], []
    for t in range(T):
        x = x_btc[:, t]
        comb = jnp.dot(jnp.concatenate([x, h, c], axis=1), fc1_w.T, precision=hi) + fc1_b
        i_t = jax.nn.sigmoid(comb[:, :H])
        f_t = jax.nn.sigmoid(comb[:, H:])
        g_t = jnp.tanh(
            jnp.dot(jnp.concatenate([x, h], axis=1), fc3_w.T, precision=hi) + fc3_b)
        c = f_t * c + i_t * g_t
        o_t = jax.nn.sigmoid(
            jnp.dot(jnp.concatenate([x, h, c], axis=1), fc2_w.T, precision=hi) + fc2_b)
        h = o_t * jnp.tanh(c)
        hs.append(h)
        cs.append(c)
    return jnp.stack(hs, axis=1), jnp.stack(cs, axis=1)


if __name__ == "__main__":
    B, T, IN_C, HID_C = 8, 8, 16, 32

    key = jax.random.PRNGKey(0)
    k = jax.random.split(key, 7)
    x = jax.random.normal(k[0], (B, T, IN_C), jnp.float32)

    def linear_init(kw, kb, fan_in, fan_out):
        bound = 1.0 / jnp.sqrt(fan_in)
        w = jax.random.uniform(kw, (fan_out, fan_in), jnp.float32, -bound, bound)
        b = jax.random.uniform(kb, (fan_out,), jnp.float32, -bound, bound)
        return w, b

    fc1_w, fc1_b = linear_init(k[1], k[2], IN_C + 2 * HID_C, 2 * HID_C)
    fc2_w, fc2_b = linear_init(k[3], k[4], IN_C + 2 * HID_C, HID_C)
    fc3_w, fc3_b = linear_init(k[5], k[6], IN_C + HID_C, HID_C)

    # One-time weight fusion, deliberately kept out of the per-call forward.
    wx, bx, whc, wco = prepare_lstm_params(
        fc1_w, fc1_b, fc2_w, fc2_b, fc3_w, fc3_b, IN_C, HID_C)

    hs, cs = lstm_cell_peep_forward(x, wx, bx, whc, wco)
    hs, cs = jax.block_until_ready((hs, cs))

    hs_ref, cs_ref = _reference(x, fc1_w, fc1_b, fc2_w, fc2_b, fc3_w, fc3_b, HID_C)
    # Tolerance deliberately loosened vs the exact-f32 reference: the kernel uses bf16
    # MXU operands (with f32 accumulation) per the performance review.
    assert jnp.allclose(hs, hs_ref, atol=2e-2, rtol=2e-2), "h mismatch"
    assert jnp.allclose(cs, cs_ref, atol=2e-2, rtol=2e-2), "c mismatch"

    print("KERNEL_OK")
</pallas_src>

<mosaic_0001>
module attributes {stable_mosaic.version = 11 : i64} {
  func.func @_lstm_peep_kernel(%arg0: memref<8x8x16xf32, #tpu.memory_space<vmem>>, %arg1: memref<16x128xbf16, #tpu.memory_space<vmem>>, %arg2: memref<1x128xf32, #tpu.memory_space<vmem>>, %arg3: memref<64x128xbf16, #tpu.memory_space<vmem>>, %arg4: memref<32x32xbf16, #tpu.memory_space<vmem>>, %arg5: memref<8x8x32xf32, #tpu.memory_space<vmem>>, %arg6: memref<8x8x32xf32, #tpu.memory_space<vmem>>, %arg7: memref<8x8x128xf32, #tpu.memory_space<vmem>>) attributes {dimension_semantics = [], scalar_prefetch = 0 : i64, scratch_operands = 1 : i64, tpu.core_type = #tpu.core_type<tc>} {
    %c0 = arith.constant 0 : index
    %c0_0 = arith.constant 0 : index
    %c0_1 = arith.constant 0 : index
    %0 = vector.load %arg0[%c0, %c0_0, %c0_1] : memref<8x8x16xf32, #tpu.memory_space<vmem>>, vector<8x8x16xf32>
    %1 = vector.shape_cast %0 : vector<8x8x16xf32> to vector<64x16xf32>
    %2 = arith.truncf %1 : vector<64x16xf32> to vector<64x16xbf16>
    %c0_2 = arith.constant 0 : index
    %c0_3 = arith.constant 0 : index
    %3 = vector.load %arg1[%c0_2, %c0_3] : memref<16x128xbf16, #tpu.memory_space<vmem>>, vector<16x128xbf16>
    %cst = arith.constant dense<0.000000e+00> : vector<64x128xf32>
    %4 = tpu.matmul %2, %3, %cst {dimension_numbers = #tpu.dot_dimension_numbers<[1], [0], [0], [1], [0, 0, 1, 1], [], []>} : vector<64x16xbf16>, vector<16x128xbf16>, vector<64x128xf32> -> vector<64x128xf32>
    %c0_4 = arith.constant 0 : index
    %c0_5 = arith.constant 0 : index
    %5 = vector.load %arg2[%c0_4, %c0_5] : memref<1x128xf32, #tpu.memory_space<vmem>>, vector<1x128xf32>
    %6 = vector.broadcast %5 : vector<1x128xf32> to vector<64x128xf32>
    %7 = arith.addf %4, %6 : vector<64x128xf32>
    %8 = vector.shape_cast %7 : vector<64x128xf32> to vector<8x8x128xf32>
    %c0_6 = arith.constant 0 : index
    %c0_7 = arith.constant 0 : index
    %c0_8 = arith.constant 0 : index
    %9 = vector.load %arg7[%c0_6, %c0_7, %c0_8] : memref<8x8x128xf32, #tpu.memory_space<vmem>>, vector<8x8x128xf32>
    tpu.vector_store %arg7[%c0_6, %c0_7, %c0_8], %8 {strides = array<i32>} : memref<8x8x128xf32, #tpu.memory_space<vmem>>, vector<8x8x128xf32>,
    %c0_9 = arith.constant 0 : index
    %c0_10 = arith.constant 0 : index
    %10 = vector.load %arg3[%c0_9, %c0_10] : memref<64x128xbf16, #tpu.memory_space<vmem>>, vector<64x128xbf16>
    %c0_11 = arith.constant 0 : index
    %c0_12 = arith.constant 0 : index
    %11 = vector.load %arg4[%c0_11, %c0_12] : memref<32x32xbf16, #tpu.memory_space<vmem>>, vector<32x32xbf16>
    %cst_13 = arith.constant 0.000000e+00 : f32
    %12 = vector.broadcast %cst_13 : f32 to vector<8x32xf32>
    %cst_14 = arith.constant 0.000000e+00 : f32
    %13 = vector.broadcast %cst_14 : f32 to vector<8x32xf32>
    %c0_i32 = arith.constant 0 : i32
    %14 = tpu.concatenate %12, %13 in 1 : vector<8x32xf32>, vector<8x32xf32> -> vector<8x64xf32>
    %15 = arith.truncf %14 : vector<8x64xf32> to vector<8x64xbf16>
    %16 = arith.index_cast %c0_i32 : i32 to index
    %c0_15 = arith.constant 0 : index
    %c0_16 = arith.constant 0 : index
    %17 = vector.load %arg7[%16, %c0_15, %c0_16] : memref<8x8x128xf32, #tpu.memory_space<vmem>>, vector<1x8x128xf32>
    %18 = vector.shape_cast %17 : vector<1x8x128xf32> to vector<8x128xf32>
    %cst_17 = arith.constant dense<0.000000e+00> : vector<8x128xf32>
    %19 = tpu.matmul %15, %10, %cst_17 {dimension_numbers = #tpu.dot_dimension_numbers<[1], [0], [0], [1], [0, 0, 1, 1], [], []>} : vector<8x64xbf16>, vector<64x128xbf16>, vector<8x128xf32> -> vector<8x128xf32>
    %20 = arith.addf %18, %19 : vector<8x128xf32>
    %21 = vector.extract_strided_slice %20 {offsets = [0, 0], sizes = [8, 32], strides = [1, 1]} : vector<8x128xf32> to vector<8x32xf32>
    %22 = arith.negf %21 : vector<8x32xf32>
    %23 = math.exp %22 : vector<8x32xf32>
    %cst_18 = arith.constant 1.000000e+00 : f32
    %24 = vector.broadcast %cst_18 : f32 to vector<8x32xf32>
    %25 = arith.addf %24, %23 : vector<8x32xf32>
    %26 = arith.divf %24, %25 : vector<8x32xf32>
    %27 = vector.extract_strided_slice %20 {offsets = [0, 32], sizes = [8, 32], strides = [1, 1]} : vector<8x128xf32> to vector<8x32xf32>
    %28 = arith.negf %27 : vector<8x32xf32>
    %29 = math.exp %28 : vector<8x32xf32>
    %cst_19 = arith.constant 1.000000e+00 : f32
    %30 = vector.broadcast %cst_19 : f32 to vector<8x32xf32>
    %31 = arith.addf %30, %29 : vector<8x32xf32>
    %32 = arith.divf %30, %31 : vector<8x32xf32>
    %33 = vector.extract_strided_slice %20 {offsets = [0, 64], sizes = [8, 32], strides = [1, 1]} : vector<8x128xf32> to vector<8x32xf32>
    %34 = math.tanh %33 : vector<8x32xf32>
    %35 = arith.mulf %32, %13 : vector<8x32xf32>
    %36 = arith.mulf %26, %34 : vector<8x32xf32>
    %37 = arith.addf %35, %36 : vector<8x32xf32>
    %38 = vector.extract_strided_slice %20 {offsets = [0, 96], sizes = [8, 32], strides = [1, 1]} : vector<8x128xf32> to vector<8x32xf32>
    %39 = arith.truncf %37 : vector<8x32xf32> to vector<8x32xbf16>
    %cst_20 = arith.constant dense<0.000000e+00> : vector<8x32xf32>
    %40 = tpu.matmul %39, %11, %cst_20 {dimension_numbers = #tpu.dot_dimension_numbers<[1], [0], [0], [1], [0, 0, 1, 1], [], []>} : vector<8x32xbf16>, vector<32x32xbf16>, vector<8x32xf32> -> vector<8x32xf32>
    %41 = arith.addf %38, %40 : vector<8x32xf32>
    %42 = arith.negf %41 : vector<8x32xf32>
    %43 = math.exp %42 : vector<8x32xf32>
    %cst_21 = arith.constant 1.000000e+00 : f32
    %44 = vector.broadcast %cst_21 : f32 to vector<8x32xf32>
    %45 = arith.addf %44, %43 : vector<8x32xf32>
    %46 = arith.divf %44, %45 : vector<8x32xf32>
    %47 = math.tanh %37 : vector<8x32xf32>
    %48 = arith.mulf %46, %47 : vector<8x32xf32>
    %49 = arith.index_cast %c0_i32 : i32 to index
    %c0_22 = arith.constant 0 : index
    %c0_23 = arith.constant 0 : index
    %50 = vector.load %arg5[%49, %c0_22, %c0_23] : memref<8x8x32xf32, #tpu.memory_space<vmem>>, vector<1x8x32xf32>
    %51 = vector.shape_cast %50 : vector<1x8x32xf32> to vector<8x32xf32>
    %52 = vector.shape_cast %48 : vector<8x32xf32> to vector<1x8x32xf32>
    tpu.vector_store %arg5[%49, %c0_22, %c0_23], %52 {strides = array<i32>} : memref<8x8x32xf32, #tpu.memory_space<vmem>>, vector<1x8x32xf32>,
    %53 = arith.index_cast %c0_i32 : i32 to index
    %c0_24 = arith.constant 0 : index
    %c0_25 = arith.constant 0 : index
    %54 = vector.load %arg6[%53, %c0_24, %c0_25] : memref<8x8x32xf32, #tpu.memory_space<vmem>>, vector<1x8x32xf32>
    %55 = vector.shape_cast %54 : vector<1x8x32xf32> to vector<8x32xf32>
    %56 = vector.shape_cast %37 : vector<8x32xf32> to vector<1x8x32xf32>
    tpu.vector_store %arg6[%53, %c0_24, %c0_25], %56 {strides = array<i32>} : memref<8x8x32xf32, #tpu.memory_space<vmem>>, vector<1x8x32xf32>,
    %c1_i32 = arith.constant 1 : i32
    %57 = tpu.concatenate %48, %37 in 1 : vector<8x32xf32>, vector<8x32xf32> -> vector<8x64xf32>
    %58 = arith.truncf %57 : vector<8x64xf32> to vector<8x64xbf16>
    %59 = arith.index_cast %c1_i32 : i32 to index
    %c0_26 = arith.constant 0 : index
    %c0_27 = arith.constant 0 : index
    %60 = vector.load %arg7[%59, %c0_26, %c0_27] : memref<8x8x128xf32, #tpu.memory_space<vmem>>, vector<1x8x128xf32>
    %61 = vector.shape_cast %60 : vector<1x8x128xf32> to vector<8x128xf32>
    %cst_28 = arith.constant dense<0.000000e+00> : vector<8x128xf32>
    %62 = tpu.matmul %58, %10, %cst_28 {dimension_numbers = #tpu.dot_dimension_numbers<[1], [0], [0], [1], [0, 0, 1, 1], [], []>} : vector<8x64xbf16>, vector<64x128xbf16>, vector<8x128xf32> -> vector<8x128xf32>
    %63 = arith.addf %61, %62 : vector<8x128xf32>
    %64 = vector.extract_strided_slice %63 {offsets = [0, 0], sizes = [8, 32], strides = [1, 1]} : vector<8x128xf32> to vector<8x32xf32>
    %65 = arith.negf %64 : vector<8x32xf32>
    %66 = math.exp %65 : vector<8x32xf32>
    %cst_29 = arith.constant 1.000000e+00 : f32
    %67 = vector.broadcast %cst_29 : f32 to vector<8x32xf32>
    %68 = arith.addf %67, %66 : vector<8x32xf32>
    %69 = arith.divf %67, %68 : vector<8x32xf32>
    %70 = vector.extract_strided_slice %63 {offsets = [0, 32], sizes = [8, 32], strides = [1, 1]} : vector<8x128xf32> to vector<8x32xf32>
    %71 = arith.negf %70 : vector<8x32xf32>
    %72 = math.exp %71 : vector<8x32xf32>
    %cst_30 = arith.constant 1.000000e+00 : f32
    %73 = vector.broadcast %cst_30 : f32 to vector<8x32xf32>
    %74 = arith.addf %73, %72 : vector<8x32xf32>
    %75 = arith.divf %73, %74 : vector<8x32xf32>
    %76 = vector.extract_strided_slice %63 {offsets = [0, 64], sizes = [8, 32], strides = [1, 1]} : vector<8x128xf32> to vector<8x32xf32>
    %77 = math.tanh %76 : vector<8x32xf32>
    %78 = arith.mulf %75, %37 : vector<8x32xf32>
    %79 = arith.mulf %69, %77 : vector<8x32xf32>
    %80 = arith.addf %78, %79 : vector<8x32xf32>
    %81 = vector.extract_strided_slice %63 {offsets = [0, 96], sizes = [8, 32], strides = [1, 1]} : vector<8x128xf32> to vector<8x32xf32>
    %82 = arith.truncf %80 : vector<8x32xf32> to vector<8x32xbf16>
    %cst_31 = arith.constant dense<0.000000e+00> : vector<8x32xf32>
    %83 = tpu.matmul %82, %11, %cst_31 {dimension_numbers = #tpu.dot_dimension_numbers<[1], [0], [0], [1], [0, 0, 1, 1], [], []>} : vector<8x32xbf16>, vector<32x32xbf16>, vector<8x32xf32> -> vector<8x32xf32>
    %84 = arith.addf %81, %83 : vector<8x32xf32>
    %85 = arith.negf %84 : vector<8x32xf32>
    %86 = math.exp %85 : vector<8x32xf32>
    %cst_32 = arith.constant 1.000000e+00 : f32
    %87 = vector.broadcast %cst_32 : f32 to vector<8x32xf32>
    %88 = arith.addf %87, %86 : vector<8x32xf32>
    %89 = arith.divf %87, %88 : vector<8x32xf32>
    %90 = math.tanh %80 : vector<8x32xf32>
    %91 = arith.mulf %89, %90 : vector<8x32xf32>
    %92 = arith.index_cast %c1_i32 : i32 to index
    %c0_33 = arith.constant 0 : index
    %c0_34 = arith.constant 0 : index
    %93 = vector.load %arg5[%92, %c0_33, %c0_34] : memref<8x8x32xf32, #tpu.memory_space<vmem>>, vector<1x8x32xf32>
    %94 = vector.shape_cast %93 : vector<1x8x32xf32> to vector<8x32xf32>
    %95 = vector.shape_cast %91 : vector<8x32xf32> to vector<1x8x32xf32>
    tpu.vector_store %arg5[%92, %c0_33, %c0_34], %95 {strides = array<i32>} : memref<8x8x32xf32, #tpu.memory_space<vmem>>, vector<1x8x32xf32>,
    %96 = arith.index_cast %c1_i32 : i32 to index
    %c0_35 = arith.constant 0 : index
    %c0_36 = arith.constant 0 : index
    %97 = vector.load %arg6[%96, %c0_35, %c0_36] : memref<8x8x32xf32, #tpu.memory_space<vmem>>, vector<1x8x32xf32>
    %98 = vector.shape_cast %97 : vector<1x8x32xf32> to vector<8x32xf32>
    %99 = vector.shape_cast %80 : vector<8x32xf32> to vector<1x8x32xf32>
    tpu.vector_store %arg6[%96, %c0_35, %c0_36], %99 {strides = array<i32>} : memref<8x8x32xf32, #tpu.memory_space<vmem>>, vector<1x8x32xf32>,
    %c2_i32 = arith.constant 2 : i32
    %100 = tpu.concatenate %91, %80 in 1 : vector<8x32xf32>, vector<8x32xf32> -> vector<8x64xf32>
    %101 = arith.truncf %100 : vector<8x64xf32> to vector<8x64xbf16>
    %102 = arith.index_cast %c2_i32 : i32 to index
    %c0_37 = arith.constant 0 : index
    %c0_38 = arith.constant 0 : index
    %103 = vector.load %arg7[%102, %c0_37, %c0_38] : memref<8x8x128xf32, #tpu.memory_space<vmem>>, vector<1x8x128xf32>
    %104 = vector.shape_cast %103 : vector<1x8x128xf32> to vector<8x128xf32>
    %cst_39 = arith.constant dense<0.000000e+00> : vector<8x128xf32>
    %105 = tpu.matmul %101, %10, %cst_39 {dimension_numbers = #tpu.dot_dimension_numbers<[1], [0], [0], [1], [0, 0, 1, 1], [], []>} : vector<8x64xbf16>, vector<64x128xbf16>, vector<8x128xf32> -> vector<8x128xf32>
    %106 = arith.addf %104, %105 : vector<8x128xf32>
    %107 = vector.extract_strided_slice %106 {offsets = [0, 0], sizes = [8, 32], strides = [1, 1]} : vector<8x128xf32> to vector<8x32xf32>
    %108 = arith.negf %107 : vector<8x32xf32>
    %109 = math.exp %108 : vector<8x32xf32>
    %cst_40 = arith.constant 1.000000e+00 : f32
    %110 = vector.broadcast %cst_40 : f32 to vector<8x32xf32>
    %111 = arith.addf %110, %109 : vector<8x32xf32>
    %112 = arith.divf %110, %111 : vector<8x32xf32>
    %113 = vector.extract_strided_slice %106 {offsets = [0, 32], sizes = [8, 32], strides = [1, 1]} : vector<8x128xf32> to vector<8x32xf32>
    %114 = arith.negf %113 : vector<8x32xf32>
    %115 = math.exp %114 : vector<8x32xf32>
    %cst_41 = arith.constant 1.000000e+00 : f32
    %116 = vector.broadcast %cst_41 : f32 to vector<8x32xf32>
    %117 = arith.addf %116, %115 : vector<8x32xf32>
    %118 = arith.divf %116, %117 : vector<8x32xf32>
    %119 = vector.extract_strided_slice %106 {offsets = [0, 64], sizes = [8, 32], strides = [1, 1]} : vector<8x128xf32> to vector<8x32xf32>
    %120 = math.tanh %119 : vector<8x32xf32>
    %121 = arith.mulf %118, %80 : vector<8x32xf32>
    %122 = arith.mulf %112, %120 : vector<8x32xf32>
    %123 = arith.addf %121, %122 : vector<8x32xf32>
    %124 = vector.extract_strided_slice %106 {offsets = [0, 96], sizes = [8, 32], strides = [1, 1]} : vector<8x128xf32> to vector<8x32xf32>
    %125 = arith.truncf %123 : vector<8x32xf32> to vector<8x32xbf16>
    %cst_42 = arith.constant dense<0.000000e+00> : vector<8x32xf32>
    %126 = tpu.matmul %125, %11, %cst_42 {dimension_numbers = #tpu.dot_dimension_numbers<[1], [0], [0], [1], [0, 0, 1, 1], [], []>} : vector<8x32xbf16>, vector<32x32xbf16>, vector<8x32xf32> -> vector<8x32xf32>
    %127 = arith.addf %124, %126 : vector<8x32xf32>
    %128 = arith.negf %127 : vector<8x32xf32>
    %129 = math.exp %128 : vector<8x32xf32>
    %cst_43 = arith.constant 1.000000e+00 : f32
    %130 = vector.broadcast %cst_43 : f32 to vector<8x32xf32>
    %131 = arith.addf %130, %129 : vector<8x32xf32>
    %132 = arith.divf %130, %131 : vector<8x32xf32>
    %133 = math.tanh %123 : vector<8x32xf32>
    %134 = arith.mulf %132, %133 : vector<8x32xf32>
    %135 = arith.index_cast %c2_i32 : i32 to index
    %c0_44 = arith.constant 0 : index
    %c0_45 = arith.constant 0 : index
    %136 = vector.load %arg5[%135, %c0_44, %c0_45] : memref<8x8x32xf32, #tpu.memory_space<vmem>>, vector<1x8x32xf32>
    %137 = vector.shape_cast %136 : vector<1x8x32xf32> to vector<8x32xf32>
    %138 = vector.shape_cast %134 : vector<8x32xf32> to vector<1x8x32xf32>
    tpu.vector_store %arg5[%135, %c0_44, %c0_45], %138 {strides = array<i32>} : memref<8x8x32xf32, #tpu.memory_space<vmem>>, vector<1x8x32xf32>,
    %139 = arith.index_cast %c2_i32 : i32 to index
    %c0_46 = arith.constant 0 : index
    %c0_47 = arith.constant 0 : index
    %140 = vector.load %arg6[%139, %c0_46, %c0_47] : memref<8x8x32xf32, #tpu.memory_space<vmem>>, vector<1x8x32xf32>
    %141 = vector.shape_cast %140 : vector<1x8x32xf32> to vector<8x32xf32>
    %142 = vector.shape_cast %123 : vector<8x32xf32> to vector<1x8x32xf32>
    tpu.vector_store %arg6[%139, %c0_46, %c0_47], %142 {strides = array<i32>} : memref<8x8x32xf32, #tpu.memory_space<vmem>>, vector<1x8x32xf32>,
    %c3_i32 = arith.constant 3 : i32
    %143 = tpu.concatenate %134, %123 in 1 : vector<8x32xf32>, vector<8x32xf32> -> vector<8x64xf32>
    %144 = arith.truncf %143 : vector<8x64xf32> to vector<8x64xbf16>
    %145 = arith.index_cast %c3_i32 : i32 to index
    %c0_48 = arith.constant 0 : index
    %c0_49 = arith.constant 0 : index
    %146 = vector.load %arg7[%145, %c0_48, %c0_49] : memref<8x8x128xf32, #tpu.memory_space<vmem>>, vector<1x8x128xf32>
    %147 = vector.shape_cast %146 : vector<1x8x128xf32> to vector<8x128xf32>
    %cst_50 = arith.constant dense<0.000000e+00> : vector<8x128xf32>
    %148 = tpu.matmul %144, %10, %cst_50 {dimension_numbers = #tpu.dot_dimension_numbers<[1], [0], [0], [1], [0, 0, 1, 1], [], []>} : vector<8x64xbf16>, vector<64x128xbf16>, vector<8x128xf32> -> vector<8x128xf32>
    %149 = arith.addf %147, %148 : vector<8x128xf32>
    %150 = vector.extract_strided_slice %149 {offsets = [0, 0], sizes = [8, 32], strides = [1, 1]} : vector<8x128xf32> to vector<8x32xf32>
    %151 = arith.negf %150 : vector<8x32xf32>
    %152 = math.exp %151 : vector<8x32xf32>
    %cst_51 = arith.constant 1.000000e+00 : f32
    %153 = vector.broadcast %cst_51 : f32 to vector<8x32xf32>
    %154 = arith.addf %153, %152 : vector<8x32xf32>
    %155 = arith.divf %153, %154 : vector<8x32xf32>
    %156 = vector.extract_strided_slice %149 {offsets = [0, 32], sizes = [8, 32], strides = [1, 1]} : vector<8x128xf32> to vector<8x32xf32>
    %157 = arith.negf %156 : vector<8x32xf32>
    %158 = math.exp %157 : vector<8x32xf32>
    %cst_52 = arith.constant 1.000000e+00 : f32
    %159 = vector.broadcast %cst_52 : f32 to vector<8x32xf32>
    %160 = arith.addf %159, %158 : vector<8x32xf32>
    %161 = arith.divf %159, %160 : vector<8x32xf32>
    %162 = vector.extract_strided_slice %149 {offsets = [0, 64], sizes = [8, 32], strides = [1, 1]} : vector<8x128xf32> to vector<8x32xf32>
    %163 = math.tanh %162 : vector<8x32xf32>
    %164 = arith.mulf %161, %123 : vector<8x32xf32>
    %165 = arith.mulf %155, %163 : vector<8x32xf32>
    %166 = arith.addf %164, %165 : vector<8x32xf32>
    %167 = vector.extract_strided_slice %149 {offsets = [0, 96], sizes = [8, 32], strides = [1, 1]} : vector<8x128xf32> to vector<8x32xf32>
    %168 = arith.truncf %166 : vector<8x32xf32> to vector<8x32xbf16>
    %cst_53 = arith.constant dense<0.000000e+00> : vector<8x32xf32>
    %169 = tpu.matmul %168, %11, %cst_53 {dimension_numbers = #tpu.dot_dimension_numbers<[1], [0], [0], [1], [0, 0, 1, 1], [], []>} : vector<8x32xbf16>, vector<32x32xbf16>, vector<8x32xf32> -> vector<8x32xf32>
    %170 = arith.addf %167, %169 : vector<8x32xf32>
    %171 = arith.negf %170 : vector<8x32xf32>
    %172 = math.exp %171 : vector<8x32xf32>
    %cst_54 = arith.constant 1.000000e+00 : f32
    %173 = vector.broadcast %cst_54 : f32 to vector<8x32xf32>
    %174 = arith.addf %173, %172 : vector<8x32xf32>
    %175 = arith.divf %173, %174 : vector<8x32xf32>
    %176 = math.tanh %166 : vector<8x32xf32>
    %177 = arith.mulf %175, %176 : vector<8x32xf32>
    %178 = arith.index_cast %c3_i32 : i32 to index
    %c0_55 = arith.constant 0 : index
    %c0_56 = arith.constant 0 : index
    %179 = vector.load %arg5[%178, %c0_55, %c0_56] : memref<8x8x32xf32, #tpu.memory_space<vmem>>, vector<1x8x32xf32>
    %180 = vector.shape_cast %179 : vector<1x8x32xf32> to vector<8x32xf32>
    %181 = vector.shape_cast %177 : vector<8x32xf32> to vector<1x8x32xf32>
    tpu.vector_store %arg5[%178, %c0_55, %c0_56], %181 {strides = array<i32>} : memref<8x8x32xf32, #tpu.memory_space<vmem>>, vector<1x8x32xf32>,
    %182 = arith.index_cast %c3_i32 : i32 to index
    %c0_57 = arith.constant 0 : index
    %c0_58 = arith.constant 0 : index
    %183 = vector.load %arg6[%182, %c0_57, %c0_58] : memref<8x8x32xf32, #tpu.memory_space<vmem>>, vector<1x8x32xf32>
    %184 = vector.shape_cast %183 : vector<1x8x32xf32> to vector<8x32xf32>
    %185 = vector.shape_cast %166 : vector<8x32xf32> to vector<1x8x32xf32>
    tpu.vector_store %arg6[%182, %c0_57, %c0_58], %185 {strides = array<i32>} : memref<8x8x32xf32, #tpu.memory_space<vmem>>, vector<1x8x32xf32>,
    %c4_i32 = arith.constant 4 : i32
    %186 = tpu.concatenate %177, %166 in 1 : vector<8x32xf32>, vector<8x32xf32> -> vector<8x64xf32>
    %187 = arith.truncf %186 : vector<8x64xf32> to vector<8x64xbf16>
    %188 = arith.index_cast %c4_i32 : i32 to index
    %c0_59 = arith.constant 0 : index
    %c0_60 = arith.constant 0 : index
    %189 = vector.load %arg7[%188, %c0_59, %c0_60] : memref<8x8x128xf32, #tpu.memory_space<vmem>>, vector<1x8x128xf32>
    %190 = vector.shape_cast %189 : vector<1x8x128xf32> to vector<8x128xf32>
    %cst_61 = arith.constant dense<0.000000e+00> : vector<8x128xf32>
    %191 = tpu.matmul %187, %10, %cst_61 {dimension_numbers = #tpu.dot_dimension_numbers<[1], [0], [0], [1], [0, 0, 1, 1], [], []>} : vector<8x64xbf16>, vector<64x128xbf16>, vector<8x128xf32> -> vector<8x128xf32>
    %192 = arith.addf %190, %191 : vector<8x128xf32>
    %193 = vector.extract_strided_slice %192 {offsets = [0, 0], sizes = [8, 32], strides = [1, 1]} : vector<8x128xf32> to vector<8x32xf32>
    %194 = arith.negf %193 : vector<8x32xf32>
    %195 = math.exp %194 : vector<8x32xf32>
    %cst_62 = arith.constant 1.000000e+00 : f32
    %196 = vector.broadcast %cst_62 : f32 to vector<8x32xf32>
    %197 = arith.addf %196, %195 : vector<8x32xf32>
    %198 = arith.divf %196, %197 : vector<8x32xf32>
    %199 = vector.extract_strided_slice %192 {offsets = [0, 32], sizes = [8, 32], strides = [1, 1]} : vector<8x128xf32> to vector<8x32xf32>
    %200 = arith.negf %199 : vector<8x32xf32>
    %201 = math.exp %200 : vector<8x32xf32>
    %cst_63 = arith.constant 1.000000e+00 : f32
    %202 = vector.broadcast %cst_63 : f32 to vector<8x32xf32>
    %203 = arith.addf %202, %201 : vector<8x32xf32>
    %204 = arith.divf %202, %203 : vector<8x32xf32>
    %205 = vector.extract_strided_slice %192 {offsets = [0, 64], sizes = [8, 32], strides = [1, 1]} : vector<8x128xf32> to vector<8x32xf32>
    %206 = math.tanh %205 : vector<8x32xf32>
    %207 = arith.mulf %204, %166 : vector<8x32xf32>
    %208 = arith.mulf %198, %206 : vector<8x32xf32>
    %209 = arith.addf %207, %208 : vector<8x32xf32>
    %210 = vector.extract_strided_slice %192 {offsets = [0, 96], sizes = [8, 32], strides = [1, 1]} : vector<8x128xf32> to vector<8x32xf32>
    %211 = arith.truncf %209 : vector<8x32xf32> to vector<8x32xbf16>
    %cst_64 = arith.constant dense<0.000000e+00> : vector<8x32xf32>
    %212 = tpu.matmul %211, %11, %cst_64 {dimension_numbers = #tpu.dot_dimension_numbers<[1], [0], [0], [1], [0, 0, 1, 1], [], []>} : vector<8x32xbf16>, vector<32x32xbf16>, vector<8x32xf32> -> vector<8x32xf32>
    %213 = arith.addf %210, %212 : vector<8x32xf32>
    %214 = arith.negf %213 : vector<8x32xf32>
    %215 = math.exp %214 : vector<8x32xf32>
    %cst_65 = arith.constant 1.000000e+00 : f32
    %216 = vector.broadcast %cst_65 : f32 to vector<8x32xf32>
    %217 = arith.addf %216, %215 : vector<8x32xf32>
    %218 = arith.divf %216, %217 : vector<8x32xf32>
    %219 = math.tanh %209 : vector<8x32xf32>
    %220 = arith.mulf %218, %219 : vector<8x32xf32>
    %221 = arith.index_cast %c4_i32 : i32 to index
    %c0_66 = arith.constant 0 : index
    %c0_67 = arith.constant 0 : index
    %222 = vector.load %arg5[%221, %c0_66, %c0_67] : memref<8x8x32xf32, #tpu.memory_space<vmem>>, vector<1x8x32xf32>
    %223 = vector.shape_cast %222 : vector<1x8x32xf32> to vector<8x32xf32>
    %224 = vector.shape_cast %220 : vector<8x32xf32> to vector<1x8x32xf32>
    tpu.vector_store %arg5[%221, %c0_66, %c0_67], %224 {strides = array<i32>} : memref<8x8x32xf32, #tpu.memory_space<vmem>>, vector<1x8x32xf32>,
    %225 = arith.index_cast %c4_i32 : i32 to index
    %c0_68 = arith.constant 0 : index
    %c0_69 = arith.constant 0 : index
    %226 = vector.load %arg6[%225, %c0_68, %c0_69] : memref<8x8x32xf32, #tpu.memory_space<vmem>>, vector<1x8x32xf32>
    %227 = vector.shape_cast %226 : vector<1x8x32xf32> to vector<8x32xf32>
    %228 = vector.shape_cast %209 : vector<8x32xf32> to vector<1x8x32xf32>
    tpu.vector_store %arg6[%225, %c0_68, %c0_69], %228 {strides = array<i32>} : memref<8x8x32xf32, #tpu.memory_space<vmem>>, vector<1x8x32xf32>,
    %c5_i32 = arith.constant 5 : i32
    %229 = tpu.concatenate %220, %209 in 1 : vector<8x32xf32>, vector<8x32xf32> -> vector<8x64xf32>
    %230 = arith.truncf %229 : vector<8x64xf32> to vector<8x64xbf16>
    %231 = arith.index_cast %c5_i32 : i32 to index
    %c0_70 = arith.constant 0 : index
    %c0_71 = arith.constant 0 : index
    %232 = vector.load %arg7[%231, %c0_70, %c0_71] : memref<8x8x128xf32, #tpu.memory_space<vmem>>, vector<1x8x128xf32>
    %233 = vector.shape_cast %232 : vector<1x8x128xf32> to vector<8x128xf32>
    %cst_72 = arith.constant dense<0.000000e+00> : vector<8x128xf32>
    %234 = tpu.matmul %230, %10, %cst_72 {dimension_numbers = #tpu.dot_dimension_numbers<[1], [0], [0], [1], [0, 0, 1, 1], [], []>} : vector<8x64xbf16>, vector<64x128xbf16>, vector<8x128xf32> -> vector<8x128xf32>
    %235 = arith.addf %233, %234 : vector<8x128xf32>
    %236 = vector.extract_strided_slice %235 {offsets = [0, 0], sizes = [8, 32], strides = [1, 1]} : vector<8x128xf32> to vector<8x32xf32>
    %237 = arith.negf %236 : vector<8x32xf32>
    %238 = math.exp %237 : vector<8x32xf32>
    %cst_73 = arith.constant 1.000000e+00 : f32
    %239 = vector.broadcast %cst_73 : f32 to vector<8x32xf32>
    %240 = arith.addf %239, %238 : vector<8x32xf32>
    %241 = arith.divf %239, %240 : vector<8x32xf32>
    %242 = vector.extract_strided_slice %235 {offsets = [0, 32], sizes = [8, 32], strides = [1, 1]} : vector<8x128xf32> to vector<8x32xf32>
    %243 = arith.negf %242 : vector<8x32xf32>
    %244 = math.exp %243 : vector<8x32xf32>
    %cst_74 = arith.constant 1.000000e+00 : f32
    %245 = vector.broadcast %cst_74 : f32 to vector<8x32xf32>
    %246 = arith.addf %245, %244 : vector<8x32xf32>
    %247 = arith.divf %245, %246 : vector<8x32xf32>
    %248 = vector.extract_strided_slice %235 {offsets = [0, 64], sizes = [8, 32], strides = [1, 1]} : vector<8x128xf32> to vector<8x32xf32>
    %249 = math.tanh %248 : vector<8x32xf32>
    %250 = arith.mulf %247, %209 : vector<8x32xf32>
    %251 = arith.mulf %241, %249 : vector<8x32xf32>
    %252 = arith.addf %250, %251 : vector<8x32xf32>
    %253 = vector.extract_strided_slice %235 {offsets = [0, 96], sizes = [8, 32], strides = [1, 1]} : vector<8x128xf32> to vector<8x32xf32>
    %254 = arith.truncf %252 : vector<8x32xf32> to vector<8x32xbf16>
    %cst_75 = arith.constant dense<0.000000e+00> : vector<8x32xf32>
    %255 = tpu.matmul %254, %11, %cst_75 {dimension_numbers = #tpu.dot_dimension_numbers<[1], [0], [0], [1], [0, 0, 1, 1], [], []>} : vector<8x32xbf16>, vector<32x32xbf16>, vector<8x32xf32> -> vector<8x32xf32>
    %256 = arith.addf %253, %255 : vector<8x32xf32>
    %257 = arith.negf %256 : vector<8x32xf32>
    %258 = math.exp %257 : vector<8x32xf32>
    %cst_76 = arith.constant 1.000000e+00 : f32
    %259 = vector.broadcast %cst_76 : f32 to vector<8x32xf32>
    %260 = arith.addf %259, %258 : vector<8x32xf32>
    %261 = arith.divf %259, %260 : vector<8x32xf32>
    %262 = math.tanh %252 : vector<8x32xf32>
    %263 = arith.mulf %261, %262 : vector<8x32xf32>
    %264 = arith.index_cast %c5_i32 : i32 to index
    %c0_77 = arith.constant 0 : index
    %c0_78 = arith.constant 0 : index
    %265 = vector.load %arg5[%264, %c0_77, %c0_78] : memref<8x8x32xf32, #tpu.memory_space<vmem>>, vector<1x8x32xf32>
    %266 = vector.shape_cast %265 : vector<1x8x32xf32> to vector<8x32xf32>
    %267 = vector.shape_cast %263 : vector<8x32xf32> to vector<1x8x32xf32>
    tpu.vector_store %arg5[%264, %c0_77, %c0_78], %267 {strides = array<i32>} : memref<8x8x32xf32, #tpu.memory_space<vmem>>, vector<1x8x32xf32>,
    %268 = arith.index_cast %c5_i32 : i32 to index
    %c0_79 = arith.constant 0 : index
    %c0_80 = arith.constant 0 : index
    %269 = vector.load %arg6[%268, %c0_79, %c0_80] : memref<8x8x32xf32, #tpu.memory_space<vmem>>, vector<1x8x32xf32>
    %270 = vector.shape_cast %269 : vector<1x8x32xf32> to vector<8x32xf32>
    %271 = vector.shape_cast %252 : vector<8x32xf32> to vector<1x8x32xf32>
    tpu.vector_store %arg6[%268, %c0_79, %c0_80], %271 {strides = array<i32>} : memref<8x8x32xf32, #tpu.memory_space<vmem>>, vector<1x8x32xf32>,
    %c6_i32 = arith.constant 6 : i32
    %272 = tpu.concatenate %263, %252 in 1 : vector<8x32xf32>, vector<8x32xf32> -> vector<8x64xf32>
    %273 = arith.truncf %272 : vector<8x64xf32> to vector<8x64xbf16>
    %274 = arith.index_cast %c6_i32 : i32 to index
    %c0_81 = arith.constant 0 : index
    %c0_82 = arith.constant 0 : index
    %275 = vector.load %arg7[%274, %c0_81, %c0_82] : memref<8x8x128xf32, #tpu.memory_space<vmem>>, vector<1x8x128xf32>
    %276 = vector.shape_cast %275 : vector<1x8x128xf32> to vector<8x128xf32>
    %cst_83 = arith.constant dense<0.000000e+00> : vector<8x128xf32>
    %277 = tpu.matmul %273, %10, %cst_83 {dimension_numbers = #tpu.dot_dimension_numbers<[1], [0], [0], [1], [0, 0, 1, 1], [], []>} : vector<8x64xbf16>, vector<64x128xbf16>, vector<8x128xf32> -> vector<8x128xf32>
    %278 = arith.addf %276, %277 : vector<8x128xf32>
    %279 = vector.extract_strided_slice %278 {offsets = [0, 0], sizes = [8, 32], strides = [1, 1]} : vector<8x128xf32> to vector<8x32xf32>
    %280 = arith.negf %279 : vector<8x32xf32>
    %281 = math.exp %280 : vector<8x32xf32>
    %cst_84 = arith.constant 1.000000e+00 : f32
    %282 = vector.broadcast %cst_84 : f32 to vector<8x32xf32>
    %283 = arith.addf %282, %281 : vector<8x32xf32>
    %284 = arith.divf %282, %283 : vector<8x32xf32>
    %285 = vector.extract_strided_slice %278 {offsets = [0, 32], sizes = [8, 32], strides = [1, 1]} : vector<8x128xf32> to vector<8x32xf32>
    %286 = arith.negf %285 : vector<8x32xf32>
    %287 = math.exp %286 : vector<8x32xf32>
    %cst_85 = arith.constant 1.000000e+00 : f32
    %288 = vector.broadcast %cst_85 : f32 to vector<8x32xf32>
    %289 = arith.addf %288, %287 : vector<8x32xf32>
    %290 = arith.divf %288, %289 : vector<8x32xf32>
    %291 = vector.extract_strided_slice %278 {offsets = [0, 64], sizes = [8, 32], strides = [1, 1]} : vector<8x128xf32> to vector<8x32xf32>
    %292 = math.tanh %291 : vector<8x32xf32>
    %293 = arith.mulf %290, %252 : vector<8x32xf32>
    %294 = arith.mulf %284, %292 : vector<8x32xf32>
    %295 = arith.addf %293, %294 : vector<8x32xf32>
    %296 = vector.extract_strided_slice %278 {offsets = [0, 96], sizes = [8, 32], strides = [1, 1]} : vector<8x128xf32> to vector<8x32xf32>
    %297 = arith.truncf %295 : vector<8x32xf32> to vector<8x32xbf16>
    %cst_86 = arith.constant dense<0.000000e+00> : vector<8x32xf32>
    %298 = tpu.matmul %297, %11, %cst_86 {dimension_numbers = #tpu.dot_dimension_numbers<[1], [0], [0], [1], [0, 0, 1, 1], [], []>} : vector<8x32xbf16>, vector<32x32xbf16>, vector<8x32xf32> -> vector<8x32xf32>
    %299 = arith.addf %296, %298 : vector<8x32xf32>
    %300 = arith.negf %299 : vector<8x32xf32>
    %301 = math.exp %300 : vector<8x32xf32>
    %cst_87 = arith.constant 1.000000e+00 : f32
    %302 = vector.broadcast %cst_87 : f32 to vector<8x32xf32>
    %303 = arith.addf %302, %301 : vector<8x32xf32>
    %304 = arith.divf %302, %303 : vector<8x32xf32>
    %305 = math.tanh %295 : vector<8x32xf32>
    %306 = arith.mulf %304, %305 : vector<8x32xf32>
    %307 = arith.index_cast %c6_i32 : i32 to index
    %c0_88 = arith.constant 0 : index
    %c0_89 = arith.constant 0 : index
    %308 = vector.load %arg5[%307, %c0_88, %c0_89] : memref<8x8x32xf32, #tpu.memory_space<vmem>>, vector<1x8x32xf32>
    %309 = vector.shape_cast %308 : vector<1x8x32xf32> to vector<8x32xf32>
    %310 = vector.shape_cast %306 : vector<8x32xf32> to vector<1x8x32xf32>
    tpu.vector_store %arg5[%307, %c0_88, %c0_89], %310 {strides = array<i32>} : memref<8x8x32xf32, #tpu.memory_space<vmem>>, vector<1x8x32xf32>,
    %311 = arith.index_cast %c6_i32 : i32 to index
    %c0_90 = arith.constant 0 : index
    %c0_91 = arith.constant 0 : index
    %312 = vector.load %arg6[%311, %c0_90, %c0_91] : memref<8x8x32xf32, #tpu.memory_space<vmem>>, vector<1x8x32xf32>
    %313 = vector.shape_cast %312 : vector<1x8x32xf32> to vector<8x32xf32>
    %314 = vector.shape_cast %295 : vector<8x32xf32> to vector<1x8x32xf32>
    tpu.vector_store %arg6[%311, %c0_90, %c0_91], %314 {strides = array<i32>} : memref<8x8x32xf32, #tpu.memory_space<vmem>>, vector<1x8x32xf32>,
    %c7_i32 = arith.constant 7 : i32
    %315 = tpu.concatenate %306, %295 in 1 : vector<8x32xf32>, vector<8x32xf32> -> vector<8x64xf32>
    %316 = arith.truncf %315 : vector<8x64xf32> to vector<8x64xbf16>
    %317 = arith.index_cast %c7_i32 : i32 to index
    %c0_92 = arith.constant 0 : index
    %c0_93 = arith.constant 0 : index
    %318 = vector.load %arg7[%317, %c0_92, %c0_93] : memref<8x8x128xf32, #tpu.memory_space<vmem>>, vector<1x8x128xf32>
    %319 = vector.shape_cast %318 : vector<1x8x128xf32> to vector<8x128xf32>
    %cst_94 = arith.constant dense<0.000000e+00> : vector<8x128xf32>
    %320 = tpu.matmul %316, %10, %cst_94 {dimension_numbers = #tpu.dot_dimension_numbers<[1], [0], [0], [1], [0, 0, 1, 1], [], []>} : vector<8x64xbf16>, vector<64x128xbf16>, vector<8x128xf32> -> vector<8x128xf32>
    %321 = arith.addf %319, %320 : vector<8x128xf32>
    %322 = vector.extract_strided_slice %321 {offsets = [0, 0], sizes = [8, 32], strides = [1, 1]} : vector<8x128xf32> to vector<8x32xf32>
    %323 = arith.negf %322 : vector<8x32xf32>
    %324 = math.exp %323 : vector<8x32xf32>
    %cst_95 = arith.constant 1.000000e+00 : f32
    %325 = vector.broadcast %cst_95 : f32 to vector<8x32xf32>
    %326 = arith.addf %325, %324 : vector<8x32xf32>
    %327 = arith.divf %325, %326 : vector<8x32xf32>
    %328 = vector.extract_strided_slice %321 {offsets = [0, 32], sizes = [8, 32], strides = [1, 1]} : vector<8x128xf32> to vector<8x32xf32>
    %329 = arith.negf %328 : vector<8x32xf32>
    %330 = math.exp %329 : vector<8x32xf32>
    %cst_96 = arith.constant 1.000000e+00 : f32
    %331 = vector.broadcast %cst_96 : f32 to vector<8x32xf32>
    %332 = arith.addf %331, %330 : vector<8x32xf32>
    %333 = arith.divf %331, %332 : vector<8x32xf32>
    %334 = vector.extract_strided_slice %321 {offsets = [0, 64], sizes = [8, 32], strides = [1, 1]} : vector<8x128xf32> to vector<8x32xf32>
    %335 = math.tanh %334 : vector<8x32xf32>
    %336 = arith.mulf %333, %295 : vector<8x32xf32>
    %337 = arith.mulf %327, %335 : vector<8x32xf32>
    %338 = arith.addf %336, %337 : vector<8x32xf32>
    %339 = vector.extract_strided_slice %321 {offsets = [0, 96], sizes = [8, 32], strides = [1, 1]} : vector<8x128xf32> to vector<8x32xf32>
    %340 = arith.truncf %338 : vector<8x32xf32> to vector<8x32xbf16>
    %cst_97 = arith.constant dense<0.000000e+00> : vector<8x32xf32>
    %341 = tpu.matmul %340, %11, %cst_97 {dimension_numbers = #tpu.dot_dimension_numbers<[1], [0], [0], [1], [0, 0, 1, 1], [], []>} : vector<8x32xbf16>, vector<32x32xbf16>, vector<8x32xf32> -> vector<8x32xf32>
    %342 = arith.addf %339, %341 : vector<8x32xf32>
    %343 = arith.negf %342 : vector<8x32xf32>
    %344 = math.exp %343 : vector<8x32xf32>
    %cst_98 = arith.constant 1.000000e+00 : f32
    %345 = vector.broadcast %cst_98 : f32 to vector<8x32xf32>
    %346 = arith.addf %345, %344 : vector<8x32xf32>
    %347 = arith.divf %345, %346 : vector<8x32xf32>
    %348 = math.tanh %338 : vector<8x32xf32>
    %349 = arith.mulf %347, %348 : vector<8x32xf32>
    %350 = arith.index_cast %c7_i32 : i32 to index
    %c0_99 = arith.constant 0 : index
    %c0_100 = arith.constant 0 : index
    %351 = vector.load %arg5[%350, %c0_99, %c0_100] : memref<8x8x32xf32, #tpu.memory_space<vmem>>, vector<1x8x32xf32>
    %352 = vector.shape_cast %351 : vector<1x8x32xf32> to vector<8x32xf32>
    %353 = vector.shape_cast %349 : vector<8x32xf32> to vector<1x8x32xf32>
    tpu.vector_store %arg5[%350, %c0_99, %c0_100], %353 {strides = array<i32>} : memref<8x8x32xf32, #tpu.memory_space<vmem>>, vector<1x8x32xf32>,
    %354 = arith.index_cast %c7_i32 : i32 to index
    %c0_101 = arith.constant 0 : index
    %c0_102 = arith.constant 0 : index
    %355 = vector.load %arg6[%354, %c0_101, %c0_102] : memref<8x8x32xf32, #tpu.memory_space<vmem>>, vector<1x8x32xf32>
    %356 = vector.shape_cast %355 : vector<1x8x32xf32> to vector<8x32xf32>
    %357 = vector.shape_cast %338 : vector<8x32xf32> to vector<1x8x32xf32>
    tpu.vector_store %arg6[%354, %c0_101, %c0_102], %357 {strides = array<i32>} : memref<8x8x32xf32, #tpu.memory_space<vmem>>, vector<1x8x32xf32>,
    %c8_i32 = arith.constant 8 : i32
    %c7 = arith.constant 7 : index
    %c0_103 = arith.constant 0 : index
    %c0_104 = arith.constant 0 : index
    %358 = vector.load %arg5[%c7, %c0_103, %c0_104] : memref<8x8x32xf32, #tpu.memory_space<vmem>>, vector<1x8x32xf32>
    %359 = vector.shape_cast %358 : vector<1x8x32xf32> to vector<8x32xf32>
    %360 = vector.shape_cast %349 : vector<8x32xf32> to vector<1x8x32xf32>
    tpu.vector_store %arg5[%c7, %c0_103, %c0_104], %360 {strides = array<i32>} : memref<8x8x32xf32, #tpu.memory_space<vmem>>, vector<1x8x32xf32>,
    %c7_105 = arith.constant 7 : index
    %c0_106 = arith.constant 0 : index
    %c0_107 = arith.constant 0 : index
    %361 = vector.load %arg6[%c7_105, %c0_106, %c0_107] : memref<8x8x32xf32, #tpu.memory_space<vmem>>, vector<1x8x32xf32>
    %362 = vector.shape_cast %361 : vector<1x8x32xf32> to vector<8x32xf32>
    %363 = vector.shape_cast %338 : vector<8x32xf32> to vector<1x8x32xf32>
    tpu.vector_store %arg6[%c7_105, %c0_106, %c0_107], %363 {strides = array<i32>} : memref<8x8x32xf32, #tpu.memory_space<vmem>>, vector<1x8x32xf32>,
    return
  }
}

</mosaic_0001>

<bundles_post_ra>
// kernel: lstm_cell_peep_forward.1
= control target key start
LH: loop header
LB: loop body
LE: loop exit
PB: predicated region body
PF: predicated region fallthrough
CT: control target
= control target key end

     0   :  { %v1735_v0 = vmov 0.0   ;;  %vm1736_vm0 = vmmov 0   ;;  %vm50_vm1 = vcmask 130048   ;;  %v1737_v12 = vmov 0.0|0.0   ;;  %s1738_s15 = smov 64   ;;  %s2205_s3 = inlined_call_operand.vmem [shape: bf16[64,128], index: 3, kind: input, shape index: {}]   ;;  %s2206_s1 = inlined_call_operand.vmem [shape: bf16[16,128], index: 1, kind: input, shape index: {}]   ;;  %s2207_s0 = inlined_call_operand.vmem [shape: f32[8,8,16], index: 0, kind: input, shape index: {}]   ;;  %s2208_s2 = inlined_call_operand.vmem [shape: f32[1,128], index: 2, kind: input, shape index: {}]   ;;  %s2209_s4 = inlined_call_operand.vmem [shape: bf16[32,32], index: 4, kind: input, shape index: {}]   ;;  %s2210_s5 = inlined_call_operand.vmem [shape: f32[8,8,32], index: 5, kind: output, shape index: {0}]   ;;  %s2211_s6 = inlined_call_operand.vmem [shape: f32[8,8,32], index: 6, kind: output, shape index: {1}]  }
   0x1   :  { %1466 = vmatprep.subr.bf16.mxu1 %v1735_v0  ;;  %v1780_v1 = vld [vmem:[%s2205_s3] sm:$0xff]   ;;  %1474 = vmatprep.mubr.msk.bf16.mxu1 %vm1736_vm0, %v1735_v0  ;;  %v1787_v2 = vld [vmem:[%s2205_s3 + $0x8] sm:$0xff]   ;;  %v25_v7 = vld [vmem:[%s2207_s0 + $0x10] sm:$0xff]  ;;  %vm253_vm2 = vcmask 261120   ;;  %vm174_vm3 = vcmask 523264  }
   0x2   :  { %1467 = vmatpush3.bf16.msra.mxu1 %v1780_v1  ;;  %v1634_v3 = vld [vmem:[%s2206_s1] sm:$0xff]   ;;  %v24_v5 = vld [vmem:[%s2207_s0 + $0x8] sm:$0xff]  ;;  %v26_v8 = vld [vmem:[%s2207_s0 + $0x18] sm:$0xff] }
   0x3   :  { %1468 = vmatprep.subr.bf16.mxu1 %v1735_v0  ;;  %v23_v4 = vld [vmem:[%s2207_s0] sm:$0xff]  ;;  %1456 = vmatprep.subr.bf16.mxu0 %v1634_v3  ;;  %v1811_v9 = vld [vmem:[%s2205_s3 + $0x10] sm:$0xff]   ;;  %v32_v10 = vpack.c.bf16 %v26_v8, %v25_v7  ;;  %v1820_v11 = vld [vmem:[%s2205_s3 + $0x18] sm:$0xff]  }
   0x4   :  { %v31_v6 = vpack.c.bf16 %v24_v5, %v23_v4  ;;  %1457 = vmatpush3.bf16.msra.mxu0 %v1634_v3  ;;  %v1842_v16 = vld [vmem:[%s2208_s2] ss:$0 sm:$0xff]  ;;  %s1739_s2 = smov 32   ;;  %v28_v32 = vld [vmem:[%s2207_s0 + $0x28] sm:$0xff]  ;;  %v29_v33 = vld [vmem:[%s2207_s0 + $0x30] sm:$0xff] }
   0x5   :  { %1478 = vmatprep.subr.bf16.mxu0 %v1735_v0  ;;  %v27_v31 = vld [vmem:[%s2207_s0 + $0x20] sm:$0xff]  ;;  %v30_v36 = vld [vmem:[%s2207_s0 + $0x38] sm:$0xff]  ;;  %v1871_v38 = vld [vmem:[%s2209_s4 + $0x8] sm:$0xff]   ;;  %s1740_s0 = smov 96  }
   0x6   :  { %1469 = vmatpush3.bf16.msra.mxu1 %v1787_v2  ;;  %1458 = vmatprep.mubr.msk.bf16.mxu0 %vm50_vm1, %v31_v6  ;;  %v1861_v34 = vld [vmem:[%s2209_s4] sm:$0xff]   ;;  %v33_v35 = vpack.c.bf16 %v28_v32, %v27_v31  ;;  %v34_v37 = vpack.c.bf16 %v30_v36, %v29_v33 }
   0x7   :  { %1470 = vmatprep.subr.bf16.mxu1 %v1735_v0  ;;  %1459 = vmatmul.mubr.msk.bf16.vlgmr.msra.gmra.mrb[0].mxu0 %vm50_vm1, %v32_v10 }
   0x8   :  { %1479 = vmatpush3.bf16.msra.mxu0 %v1861_v34  ;;  %1462 = vmatprep.mubr.msk.bf16.mxu0 %vm50_vm1, %v33_v35 }
   0x9   :  { %1480 = vmatprep.subr.bf16.mxu0 %v1735_v0 }
   0xa   :  { %1471 = vmatpush3.bf16.msra.mxu1 %v1811_v9 }
   0xb   :  { %1472 = vmatprep.subr.bf16.mxu1 %v1735_v0 }
   0xc   :  { %1481 = vmatpush3.bf16.msra.mxu0 %v1871_v38 }
   0xd   :  { %1498 = vmatprep.subr.bf16.mxu0 %v1735_v0 }
   0xe   :  { %1473 = vmatpush3.bf16.msra.mxu1 %v1820_v11 }
   0xf   :  { %1486 = vmatprep.subr.bf16.mxu1 %v1735_v0  ;;  %1463 = vmatmul.mubr.msk.bf16.gmra.mrb[4].mxu0 %vm50_vm1, %v34_v37 }
  0x10   :  { %1482 = vmatprep.mubr.msk.bf16.mxu0 %vm1736_vm0, %v1735_v0 }
  0x11   :  { %1475 = vmatmul.mubr.bf16.vlgmr.msra.gmra.mrb[0].mxu1 %v1737_v12 }
  0x12   :  { %1487 = vmatpush3.bf16.msra.mxu1 %v1780_v1  ;;  %1494 = vmatprep.mubr.msk.bf16.mxu1 %vm1736_vm0, %v1735_v0 }
  0x13   :  { %1488 = vmatprep.subr.bf16.mxu1 %v1735_v0 }
  0x16   :  { %1489 = vmatpush3.bf16.msra.mxu1 %v1787_v2 }
  0x17   :  { %1490 = vmatprep.subr.bf16.mxu1 %v1735_v0 }
  0x1a   :  { %1491 = vmatpush3.bf16.msra.mxu1 %v1811_v9 }
  0x1b   :  { %1492 = vmatprep.subr.bf16.mxu1 %v1735_v0 }
  0x1e   :  { %1493 = vmatpush3.bf16.msra.mxu1 %v1820_v11 }
  0x1f   :  { %1518 = vmatprep.subr.bf16.mxu1 %v1735_v0 }
  0xda   :  { %v1835_v13 = vpop.f32.mrb[0].mxu0 }
  0xdb   :  { %v97_v14 = vpop.f32.mrb[1].mxu0 }
  0xdc   :  { %v1837_v15 = vpop.f32.mrb[2].mxu0  ;;  %v98_v18 = vadd.f32 %v1842_v16, %v97_v14 }
  0xdd   :  { %v1844_v17 = vpop.f32.mrb[3].mxu0 }
  0xde   :  { %v101_v3 = vadd.f32 %v1842_v16, %v1844_v17 }
  0xe2   :  { %v1886_v44 = vpop.f32.mrb[4].mxu0 }
  0xe3   :  { %v1888_v45 = vpop.f32.mrb[5].mxu0 }
  0xe4   :  { %v212_v19 = vpop.f32.mrb[0].mxu1  ;;  %v1890_v46 = vpop.f32.mrb[6].mxu0 }
  0xe5   :  { %v218_v20 = vadd.f32 %v212_v19, %v98_v18  ;;  %v1476_v21 = vpop.f32.mrb[1].mxu1  ;;  %v1892_v47 = vpop.f32.mrb[7].mxu0 }
  0xe6   :  { %v215_v22 = vpop.f32.mrb[2].mxu1 }
  0xe7   :  { %1639 = vtanh.f32 %v218_v20  ;;  %v1477_v23 = vpop.f32.mrb[3].mxu1  ;;  %v1338_v25 = vmul.f32 -1.442695, %v218_v20 }
  0xe9   :  { %1641 = vpow2.f32 %v1338_v25 }
  0xf1   :  { %v1640_v24 = vpop.eup %1639 }
  0xf2   :  { %228 = vrot.lane.b32.xlu0 %v1640_v24, %s1738_s15 }
  0xf3   :  { %v1642_v26 = vpop.eup %1641 }
  0xf4   :  { %v222_v27 = vadd.f32 1.0, %v1642_v26 }
  0xf6   :  { %1643 = vrcp.f32 %v222_v27 }
 0x100   :  { %v1644_v28 = vpop.eup %1643 }
 0x101   :  { %v226_v39 = vmul.f32 0.0, %v1644_v28 }
 0x164   :  { %v229_v29 = vpop.permute.xlu0 %228 }
 0x165   :  { %v231_v30 = vmul.f32 %v1644_v28, %v229_v29 }
 0x167   :  { %233 = vrot.lane.b32.xlu0 %v231_v30, %s1739_s2 }
 0x1d9   :  { %v234_v40 = vpop.permute.xlu0 %233 }
 0x1da   :  { %v1879_v41 = vadd.f32 %v234_v40, %v226_v39 }
 0x1dc   :  { %1645 = vtanh.f32 %v1879_v41  ;;  %v237_v42 = vpack.c.bf16 %v1879_v41, %v1879_v41 }
 0x1de   :  { %239 = vrot.lane.b32.xlu1 %v237_v42, %s1740_s0 }
 0x1e6   :  { %v1646_v43 = vpop.eup %1645 }
 0x1e7   :  { %310 = vrot.lane.b32.xlu0 %v1646_v43, %s1738_s15 }
 0x250   :  { %v240_v48 = vpop.permute.xlu1 %239 }
 0x251   :  { %1483 = vmatmul.mubr.msk.bf16.vlgmr.msra.gmra.mrb[8].mxu0 %vm253_vm2, %v240_v48 }
 0x252   :  { %1499 = vmatpush3.bf16.msra.mxu0 %v1861_v34  ;;  %1502 = vmatprep.mubr.msk.bf16.mxu0 %vm1736_vm0, %v1735_v0 }
 0x253   :  { %1500 = vmatprep.subr.bf16.mxu0 %v1735_v0 }
 0x256   :  { %1501 = vmatpush3.bf16.msra.mxu0 %v1871_v38 }
 0x257   :  { %1506 = vmatprep.subr.bf16.mxu0 %v1735_v0 }
 0x259   :  { %v311_v59 = vpop.permute.xlu0 %310 }
 0x324   :  { %v291_v49 = vpop.f32.mrb[8].mxu0 }
 0x325   :  { %298 = vrot.lane.b32.xlu1 %v291_v49, %s1740_s0  ;;  %v1484_v50 = vpop.f32.mrb[9].mxu0  ;;  %v106_v49 = vadd.f32 %v1835_v13, %v1842_v16 }
 0x326   :  { %v294_v51 = vpop.f32.mrb[10].mxu0 }
 0x327   :  { %v1485_v52 = vpop.f32.mrb[11].mxu0 }
 0x397   :  { %v299_v53 = vpop.permute.xlu1 %298 }
 0x398   :  { %v301_v54 = vadd.f32 %v299_v53, %v218_v20 }
 0x39a   :  { %v1342_v55 = vmul.f32 -1.442695, %v301_v54 }
 0x39c   :  { %1647 = vpow2.f32 %v1342_v55 }
 0x3a6   :  { %v1648_v56 = vpop.eup %1647 }
 0x3a7   :  { %v305_v57 = vadd.f32 1.0, %v1648_v56 }
 0x3a9   :  { %1649 = vrcp.f32 %v305_v57 }
 0x3b3   :  { %v1650_v58 = vpop.eup %1649 }
 0x3b4   :  { %v313_v60 = vmul.f32 %v1650_v58, %v311_v59 }
 0x3b6   :  { %315 = vrot.lane.b32.xlu1 %v313_v60, %s1739_s2 }
 0x428   :  { %v316_v61 = vpop.permute.xlu1 %315 }
 0x429   :  { %318 = vst.msk [vmem:[%s2210_s5] sm:$0xff] %vm253_vm2, %v316_v61  ;;  %v324_v62 = vsel %vm253_vm2, %v316_v61, %v1879_v41 }
 0x42a   :  { %v325_v63 = vpack.c.bf16 %v324_v62, %v324_v62 }
 0x42c   :  { %1495 = vmatmul.mubr.msk.bf16.vlgmr.msra.gmra.mrb[4].mxu1 %vm174_vm3, %v325_v63 }
 0x42d   :  { %1519 = vmatpush3.bf16.msra.mxu1 %v1861_v34  ;;  %1522 = vmatprep.mubr.msk.bf16.mxu1 %vm1736_vm0, %v1735_v0 }
 0x42e   :  { %1520 = vmatprep.subr.bf16.mxu1 %v1735_v0 }
 0x431   :  { %1521 = vmatpush3.bf16.msra.mxu1 %v1871_v38 }
 0x432   :  { %1526 = vmatprep.subr.bf16.mxu1 %v1735_v0 }
 0x4ff   :  { %v365_v4 = vpop.f32.mrb[4].mxu1 }
 0x500   :  { %v371_v5 = vadd.f32 %v365_v4, %v101_v3  ;;  %v1496_v6 = vpop.f32.mrb[5].mxu1 }
 0x501   :  { %v368_v7 = vpop.f32.mrb[6].mxu1 }
 0x502   :  { %1651 = vtanh.f32 %v371_v5  ;;  %v1497_v8 = vpop.f32.mrb[7].mxu1  ;;  %v1344_v12 = vmul.f32 -1.442695, %v371_v5 }
 0x504   :  { %1653 = vpow2.f32 %v1344_v12 }
 0x50c   :  { %v1652_v10 = vpop.eup %1651 }
 0x50d   :  { %381 = vrot.lane.b32.xlu0 %v1652_v10, %s1738_s15 }
 0x50e   :  { %v1654_v14 = vpop.eup %1653 }
 0x50f   :  { %v375_v18 = vadd.f32 1.0, %v1654_v14 }
 0x511   :  { %1655 = vrcp.f32 %v375_v18 }
 0x51b   :  { %v1656_v19 = vpop.eup %1655 }
 0x51c   :  { %v379_v17 = vmul.f32 %v1656_v19, %v1879_v41 }
 0x57f   :  { %v382_v20 = vpop.permute.xlu0 %381 }
 0x580   :  { %v384_v21 = vmul.f32 %v1656_v19, %v382_v20 }
 0x582   :  { %386 = vrot.lane.b32.xlu1 %v384_v21, %s1739_s2 }
 0x5f4   :  { %v387_v22 = vpop.permute.xlu1 %386 }
 0x5f5   :  { %v1921_v23 = vadd.f32 %v387_v22, %v379_v17 }
 0x5f7   :  { %1657 = vtanh.f32 %v1921_v23  ;;  %v390_v24 = vpack.c.bf16 %v1921_v23, %v1921_v23 }
 0x5f9   :  { %392 = vrot.lane.b32.xlu0 %v390_v24, %s1740_s0 }
 0x601   :  { %v1658_v25 = vpop.eup %1657 }
 0x602   :  { %450 = vrot.lane.b32.xlu0 %v1658_v25, %s1738_s15 }
 0x66b   :  { %v393_v26 = vpop.permute.xlu0 %392 }
 0x66c   :  { %1503 = vmatmul.mubr.msk.bf16.vlgmr.msra.gmra.mrb[12].mxu0 %vm253_vm2, %v393_v26 }
 0x66d   :  { %1507 = vmatpush3.bf16.msra.mxu0 %v1780_v1  ;;  %1514 = vmatprep.mubr.msk.bf16.mxu0 %vm1736_vm0, %v1735_v0 }
 0x66e   :  { %1508 = vmatprep.subr.bf16.mxu0 %v1735_v0 }
 0x671   :  { %1509 = vmatpush3.bf16.msra.mxu0 %v1787_v2 }
 0x672   :  { %1510 = vmatprep.subr.bf16.mxu0 %v1735_v0 }
 0x674   :  { %v451_v39 = vpop.permute.xlu0 %450 }
 0x675   :  { %1511 = vmatpush3.bf16.msra.mxu0 %v1811_v9 }
 0x676   :  { %1512 = vmatprep.subr.bf16.mxu0 %v1735_v0 }
 0x679   :  { %1513 = vmatpush3.bf16.msra.mxu0 %v1820_v11 }
 0x67a   :  { %1538 = vmatprep.subr.bf16.mxu0 %v1735_v0 }
 0x73f   :  { %v431_v27 = vpop.f32.mrb[12].mxu0 }
 0x740   :  { %438 = vrot.lane.b32.xlu1 %v431_v27, %s1740_s0  ;;  %v1504_v28 = vpop.f32.mrb[13].mxu0  ;;  %v109_v27 = vadd.f32 %v1837_v15, %v1842_v16 }
 0x741   :  { %v434_v29 = vpop.f32.mrb[14].mxu0 }
 0x742   :  { %v1505_v30 = vpop.f32.mrb[15].mxu0 }
 0x7b2   :  { %v439_v31 = vpop.permute.xlu1 %438 }
 0x7b3   :  { %v441_v32 = vadd.f32 %v439_v31, %v371_v5 }
 0x7b5   :  { %v1346_v33 = vmul.f32 -1.442695, %v441_v32 }
 0x7b7   :  { %1659 = vpow2.f32 %v1346_v33 }
 0x7c1   :  { %v1660_v35 = vpop.eup %1659 }
 0x7c2   :  { %v445_v36 = vadd.f32 1.0, %v1660_v35 }
 0x7c4   :  { %1661 = vrcp.f32 %v445_v36 }
 0x7ce   :  { %v1662_v37 = vpop.eup %1661 }
 0x7cf   :  { %v453_v40 = vmul.f32 %v1662_v37, %v451_v39 }
 0x7d1   :  { %455 = vrot.lane.b32.xlu1 %v453_v40, %s1739_s2 }
 0x843   :  { %v456_v42 = vpop.permute.xlu1 %455 }
 0x844   :  { %1347 = vst.msk [vmem:[%s2210_s5 + $0x8] sm:$0xff] %vm253_vm2, %v456_v42  ;;  %v466_v43 = vsel %vm253_vm2, %v456_v42, %v1921_v23 }
 0x845   :  { %v467_v48 = vpack.c.bf16 %v466_v43, %v466_v43 }
 0x847   :  { %1515 = vmatmul.mubr.msk.bf16.vlgmr.msra.gmra.mrb[16].mxu0 %vm174_vm3, %v467_v48 }
 0x848   :  { %1539 = vmatpush3.bf16.msra.mxu0 %v1861_v34  ;;  %1542 = vmatprep.mubr.msk.bf16.mxu0 %vm1736_vm0, %v1735_v0 }
 0x849   :  { %1540 = vmatprep.subr.bf16.mxu0 %v1735_v0 }
 0x84c   :  { %1541 = vmatpush3.bf16.msra.mxu0 %v1871_v38 }
 0x84d   :  { %1546 = vmatprep.subr.bf16.mxu0 %v1735_v0 }
 0x91a   :  { %v507_v50 = vpop.f32.mrb[16].mxu0 }
 0x91b   :  { %v513_v51 = vadd.f32 %v507_v50, %v106_v49  ;;  %v1516_v52 = vpop.f32.mrb[17].mxu0 }
 0x91c   :  { %v510_v53 = vpop.f32.mrb[18].mxu0 }
 0x91d   :  { %1663 = vtanh.f32 %v513_v51  ;;  %v1517_v54 = vpop.f32.mrb[19].mxu0  ;;  %v1350_v56 = vmul.f32 -1.442695, %v513_v51 }
 0x91f   :  { %1665 = vpow2.f32 %v1350_v56 }
 0x927   :  { %v1664_v55 = vpop.eup %1663 }
 0x928   :  { %523 = vrot.lane.b32.xlu0 %v1664_v55, %s1738_s15 }
 0x929   :  { %v1666_v57 = vpop.eup %1665 }
 0x92a   :  { %v517_v58 = vadd.f32 1.0, %v1666_v57 }
 0x92c   :  { %1667 = vrcp.f32 %v517_v58 }
 0x936   :  { %v1668_v59 = vpop.eup %1667 }
 0x937   :  { %v521_v13 = vmul.f32 %v1668_v59, %v1921_v23 }
 0x99a   :  { %v524_v60 = vpop.permute.xlu0 %523 }
 0x99b   :  { %v526_v61 = vmul.f32 %v1668_v59, %v524_v60 }
 0x99d   :  { %528 = vrot.lane.b32.xlu1 %v526_v61, %s1739_s2 }
 0xa0f   :  { %v529_v62 = vpop.permute.xlu1 %528 }
 0xa10   :  { %v1959_v63 = vadd.f32 %v529_v62, %v521_v13 }
 0xa12   :  { %1669 = vtanh.f32 %v1959_v63  ;;  %v532_v3 = vpack.c.bf16 %v1959_v63, %v1959_v63 }
 0xa14   :  { %534 = vrot.lane.b32.xlu0 %v532_v3, %s1740_s0 }
 0xa1c   :  { %v1670_v4 = vpop.eup %1669 }
 0xa1d   :  { %592 = vrot.lane.b32.xlu0 %v1670_v4, %s1738_s15 }
 0xa86   :  { %v535_v5 = vpop.permute.xlu0 %534 }
 0xa87   :  { %1523 = vmatmul.mubr.msk.bf16.vlgmr.msra.gmra.mrb[8].mxu1 %vm253_vm2, %v535_v5 }
 0xa88   :  { %1527 = vmatpush3.bf16.msra.mxu1 %v1780_v1  ;;  %1534 = vmatprep.mubr.msk.bf16.mxu1 %vm1736_vm0, %v1735_v0 }
 0xa89   :  { %1528 = vmatprep.subr.bf16.mxu1 %v1735_v0 }
 0xa8c   :  { %1529 = vmatpush3.bf16.msra.mxu1 %v1787_v2 }
 0xa8d   :  { %1530 = vmatprep.subr.bf16.mxu1 %v1735_v0 }
 0xa8f   :  { %v593_v17 = vpop.permute.xlu0 %592 }
 0xa90   :  { %1531 = vmatpush3.bf16.msra.mxu1 %v1811_v9 }
 0xa91   :  { %1532 = vmatprep.subr.bf16.mxu1 %v1735_v0 }
 0xa94   :  { %1533 = vmatpush3.bf16.msra.mxu1 %v1820_v11 }
 0xa95   :  { %1558 = vmatprep.subr.bf16.mxu1 %v1735_v0 }
 0xb5a   :  { %v573_v6 = vpop.f32.mrb[8].mxu1 }
 0xb5b   :  { %580 = vrot.lane.b32.xlu1 %v573_v6, %s1740_s0  ;;  %v1524_v7 = vpop.f32.mrb[9].mxu1  ;;  %v114_v6 = vadd.f32 %v1842_v16, %v1888_v45 }
 0xb5c   :  { %v576_v8 = vpop.f32.mrb[10].mxu1 }
 0xb5d   :  { %v1525_v10 = vpop.f32.mrb[11].mxu1 }
 0xbcd   :  { %v581_v12 = vpop.permute.xlu1 %580 }
 0xbce   :  { %v583_v14 = vadd.f32 %v581_v12, %v513_v51 }
 0xbd0   :  { %v1352_v18 = vmul.f32 -1.442695, %v583_v14 }
 0xbd2   :  { %1671 = vpow2.f32 %v1352_v18 }
 0xbdc   :  { %v1672_v19 = vpop.eup %1671 }
 0xbdd   :  { %v587_v20 = vadd.f32 1.0, %v1672_v19 }
 0xbdf   :  { %1673 = vrcp.f32 %v587_v20 }
 0xbe9   :  { %v1674_v21 = vpop.eup %1673 }
 0xbea   :  { %v595_v22 = vmul.f32 %v1674_v21, %v593_v17 }
 0xbec   :  { %597 = vrot.lane.b32.xlu1 %v595_v22, %s1739_s2 }
 0xc5e   :  { %v598_v24 = vpop.permute.xlu1 %597 }
 0xc5f   :  { %1353 = vst.msk [vmem:[%s2210_s5 + $0x10] sm:$0xff] %vm253_vm2, %v598_v24  ;;  %v608_v25 = vsel %vm253_vm2, %v598_v24, %v1959_v63 }
 0xc60   :  { %v609_v26 = vpack.c.bf16 %v608_v25, %v608_v25 }
 0xc62   :  { %1535 = vmatmul.mubr.msk.bf16.vlgmr.msra.gmra.mrb[12].mxu1 %vm174_vm3, %v609_v26 }
 0xc63   :  { %1559 = vmatpush3.bf16.msra.mxu1 %v1861_v34  ;;  %1562 = vmatprep.mubr.msk.bf16.mxu1 %vm1736_vm0, %v1735_v0 }
 0xc64   :  { %1560 = vmatprep.subr.bf16.mxu1 %v1735_v0 }
 0xc67   :  { %1561 = vmatpush3.bf16.msra.mxu1 %v1871_v38 }
 0xc68   :  { %1566 = vmatprep.subr.bf16.mxu1 %v1735_v0 }
 0xd35   :  { %v649_v28 = vpop.f32.mrb[12].mxu1 }
 0xd36   :  { %v655_v29 = vadd.f32 %v649_v28, %v109_v27  ;;  %v1536_v30 = vpop.f32.mrb[13].mxu1 }
 0xd37   :  { %v652_v31 = vpop.f32.mrb[14].mxu1 }
 0xd38   :  { %1675 = vtanh.f32 %v655_v29  ;;  %v1537_v32 = vpop.f32.mrb[15].mxu1  ;;  %v1356_v35 = vmul.f32 -1.442695, %v655_v29 }
 0xd3a   :  { %1677 = vpow2.f32 %v1356_v35 }
 0xd42   :  { %v1676_v33 = vpop.eup %1675 }
 0xd43   :  { %665 = vrot.lane.b32.xlu0 %v1676_v33, %s1738_s15 }
 0xd44   :  { %v1678_v36 = vpop.eup %1677 }
 0xd45   :  { %v659_v37 = vadd.f32 1.0, %v1678_v36 }
 0xd47   :  { %1679 = vrcp.f32 %v659_v37 }
 0xd51   :  { %v1680_v39 = vpop.eup %1679 }
 0xd52   :  { %v663_v15 = vmul.f32 %v1680_v39, %v1959_v63 }
 0xdb5   :  { %v666_v40 = vpop.permute.xlu0 %665 }
 0xdb6   :  { %v668_v42 = vmul.f32 %v1680_v39, %v666_v40 }
 0xdb8   :  { %670 = vrot.lane.b32.xlu1 %v668_v42, %s1739_s2 }
 0xe2a   :  { %v671_v43 = vpop.permute.xlu1 %670 }
 0xe2b   :  { %v1997_v48 = vadd.f32 %v671_v43, %v663_v15 }
 0xe2d   :  { %1681 = vtanh.f32 %v1997_v48  ;;  %v674_v49 = vpack.c.bf16 %v1997_v48, %v1997_v48 }
 0xe2f   :  { %676 = vrot.lane.b32.xlu0 %v674_v49, %s1740_s0 }
 0xe37   :  { %v1682_v50 = vpop.eup %1681 }
 0xe38   :  { %734 = vrot.lane.b32.xlu0 %v1682_v50, %s1738_s15 }
 0xea1   :  { %v677_v51 = vpop.permute.xlu0 %676 }
 0xea2   :  { %1543 = vmatmul.mubr.msk.bf16.vlgmr.msra.gmra.mrb[20].mxu0 %vm253_vm2, %v677_v51 }
 0xea3   :  { %1547 = vmatpush3.bf16.msra.mxu0 %v1780_v1  ;;  %1554 = vmatprep.mubr.msk.bf16.mxu0 %vm1736_vm0, %v1735_v0 }
 0xea4   :  { %1548 = vmatprep.subr.bf16.mxu0 %v1735_v0 }
 0xea7   :  { %1549 = vmatpush3.bf16.msra.mxu0 %v1787_v2 }
 0xea8   :  { %1550 = vmatprep.subr.bf16.mxu0 %v1735_v0 }
 0xeaa   :  { %v735_v13 = vpop.permute.xlu0 %734 }
 0xeab   :  { %1551 = vmatpush3.bf16.msra.mxu0 %v1811_v9 }
 0xeac   :  { %1552 = vmatprep.subr.bf16.mxu0 %v1735_v0 }
 0xeaf   :  { %1553 = vmatpush3.bf16.msra.mxu0 %v1820_v11 }
 0xeb0   :  { %1578 = vmatprep.subr.bf16.mxu0 %v1735_v0 }
 0xf75   :  { %v715_v52 = vpop.f32.mrb[20].mxu0 }
 0xf76   :  { %722 = vrot.lane.b32.xlu1 %v715_v52, %s1740_s0  ;;  %v1544_v53 = vpop.f32.mrb[21].mxu0  ;;  %v117_v52 = vadd.f32 %v1842_v16, %v1892_v47 }
 0xf77   :  { %v718_v54 = vpop.f32.mrb[22].mxu0 }
 0xf78   :  { %v1545_v55 = vpop.f32.mrb[23].mxu0 }
 0xfe8   :  { %v723_v56 = vpop.permute.xlu1 %722 }
 0xfe9   :  { %v725_v57 = vadd.f32 %v723_v56, %v655_v29 }
 0xfeb   :  { %v1358_v58 = vmul.f32 -1.442695, %v725_v57 }
 0xfed   :  { %1683 = vpow2.f32 %v1358_v58 }
 0xff7   :  { %v1684_v59 = vpop.eup %1683 }
 0xff8   :  { %v729_v60 = vadd.f32 1.0, %v1684_v59 }
 0xffa   :  { %1685 = vrcp.f32 %v729_v60 }
0x1004   :  { %v1686_v61 = vpop.eup %1685 }
0x1005   :  { %v737_v62 = vmul.f32 %v1686_v61, %v735_v13 }
0x1007   :  { %739 = vrot.lane.b32.xlu1 %v737_v62, %s1739_s2 }
0x1079   :  { %v740_v3 = vpop.permute.xlu1 %739 }
0x107a   :  { %1359 = vst.msk [vmem:[%s2210_s5 + $0x18] sm:$0xff] %vm253_vm2, %v740_v3  ;;  %v750_v4 = vsel %vm253_vm2, %v740_v3, %v1997_v48 }
0x107b   :  { %v751_v5 = vpack.c.bf16 %v750_v4, %v750_v4 }
0x107d   :  { %1555 = vmatmul.mubr.msk.bf16.vlgmr.msra.gmra.mrb[24].mxu0 %vm174_vm3, %v751_v5 }
0x107e   :  { %1579 = vmatpush3.bf16.msra.mxu0 %v1861_v34  ;;  %1582 = vmatprep.mubr.msk.bf16.mxu0 %vm1736_vm0, %v1735_v0 }
0x107f   :  { %1580 = vmatprep.subr.bf16.mxu0 %v1735_v0 }
0x1082   :  { %1581 = vmatpush3.bf16.msra.mxu0 %v1871_v38 }
0x1083   :  { %1586 = vmatprep.subr.bf16.mxu0 %v1735_v0 }
0x1150   :  { %v791_v7 = vpop.f32.mrb[24].mxu0 }
0x1151   :  { %v797_v8 = vadd.f32 %v791_v7, %v114_v6  ;;  %v1556_v10 = vpop.f32.mrb[25].mxu0 }
0x1152   :  { %v794_v12 = vpop.f32.mrb[26].mxu0 }
0x1153   :  { %1687 = vtanh.f32 %v797_v8  ;;  %v1557_v14 = vpop.f32.mrb[27].mxu0  ;;  %v1362_v19 = vmul.f32 -1.442695, %v797_v8 }
0x1155   :  { %1689 = vpow2.f32 %v1362_v19 }
0x115d   :  { %v1688_v18 = vpop.eup %1687 }
0x115e   :  { %807 = vrot.lane.b32.xlu0 %v1688_v18, %s1738_s15 }
0x115f   :  { %v1690_v20 = vpop.eup %1689 }
0x1160   :  { %v801_v21 = vadd.f32 1.0, %v1690_v20 }
0x1162   :  { %1691 = vrcp.f32 %v801_v21 }
0x116c   :  { %v1692_v17 = vpop.eup %1691 }
0x116d   :  { %v805_v45 = vmul.f32 %v1692_v17, %v1997_v48 }
0x11d0   :  { %v808_v22 = vpop.permute.xlu0 %807 }
0x11d1   :  { %v810_v24 = vmul.f32 %v1692_v17, %v808_v22 }
0x11d3   :  { %812 = vrot.lane.b32.xlu1 %v810_v24, %s1739_s2 }
0x1245   :  { %v813_v25 = vpop.permute.xlu1 %812 }
0x1246   :  { %v2035_v26 = vadd.f32 %v813_v25, %v805_v45 }
0x1248   :  { %1693 = vtanh.f32 %v2035_v26  ;;  %v816_v27 = vpack.c.bf16 %v2035_v26, %v2035_v26 }
0x124a   :  { %818 = vrot.lane.b32.xlu0 %v816_v27, %s1740_s0 }
0x1252   :  { %v1694_v28 = vpop.eup %1693 }
0x1253   :  { %876 = vrot.lane.b32.xlu0 %v1694_v28, %s1738_s15 }
0x12bc   :  { %v819_v29 = vpop.permute.xlu0 %818 }
0x12bd   :  { %1563 = vmatmul.mubr.msk.bf16.vlgmr.msra.gmra.mrb[16].mxu1 %vm253_vm2, %v819_v29 }
0x12be   :  { %1567 = vmatpush3.bf16.msra.mxu1 %v1780_v1  ;;  %1574 = vmatprep.mubr.msk.bf16.mxu1 %vm1736_vm0, %v1735_v0 }
0x12bf   :  { %1568 = vmatprep.subr.bf16.mxu1 %v1735_v0 }
0x12c2   :  { %1569 = vmatpush3.bf16.msra.mxu1 %v1787_v2 }
0x12c3   :  { %1570 = vmatprep.subr.bf16.mxu1 %v1735_v0 }
0x12c5   :  { %v877_v15 = vpop.permute.xlu0 %876 }
0x12c6   :  { %1571 = vmatpush3.bf16.msra.mxu1 %v1811_v9 }
0x12c7   :  { %1572 = vmatprep.subr.bf16.mxu1 %v1735_v0 }
0x12ca   :  { %1573 = vmatpush3.bf16.msra.mxu1 %v1820_v11 }
0x12cb   :  { %1598 = vmatprep.subr.bf16.mxu1 %v1735_v0 }
0x1390   :  { %v857_v30 = vpop.f32.mrb[16].mxu1 }
0x1391   :  { %864 = vrot.lane.b32.xlu1 %v857_v30, %s1740_s0  ;;  %v1564_v31 = vpop.f32.mrb[17].mxu1  ;;  %v122_v30 = vadd.f32 %v1886_v44, %v1842_v16 }
0x1392   :  { %v860_v32 = vpop.f32.mrb[18].mxu1 }
0x1393   :  { %v1565_v33 = vpop.f32.mrb[19].mxu1 }
0x1403   :  { %v865_v35 = vpop.permute.xlu1 %864 }
0x1404   :  { %v867_v36 = vadd.f32 %v865_v35, %v797_v8 }
0x1406   :  { %v1364_v37 = vmul.f32 -1.442695, %v867_v36 }
0x1408   :  { %1695 = vpow2.f32 %v1364_v37 }
0x1412   :  { %v1696_v39 = vpop.eup %1695 }
0x1413   :  { %v871_v40 = vadd.f32 1.0, %v1696_v39 }
0x1415   :  { %1697 = vrcp.f32 %v871_v40 }
0x141f   :  { %v1698_v42 = vpop.eup %1697 }
0x1420   :  { %v879_v43 = vmul.f32 %v1698_v42, %v877_v15 }
0x1422   :  { %881 = vrot.lane.b32.xlu1 %v879_v43, %s1739_s2 }
0x1494   :  { %v882_v49 = vpop.permute.xlu1 %881 }
0x1495   :  { %1365 = vst.msk [vmem:[%s2210_s5 + $0x20] sm:$0xff] %vm253_vm2, %v882_v49  ;;  %v892_v50 = vsel %vm253_vm2, %v882_v49, %v2035_v26 }
0x1496   :  { %v893_v51 = vpack.c.bf16 %v892_v50, %v892_v50 }
0x1498   :  { %1575 = vmatmul.mubr.msk.bf16.vlgmr.msra.gmra.mrb[20].mxu1 %vm174_vm3, %v893_v51 }
0x1499   :  { %1599 = vmatpush3.bf16.msra.mxu1 %v1861_v34  ;;  %1602 = vmatprep.mubr.msk.bf16.mxu1 %vm1736_vm0, %v1735_v0 }
0x149a   :  { %1600 = vmatprep.subr.bf16.mxu1 %v1735_v0 }
0x149d   :  { %1601 = vmatpush3.bf16.msra.mxu1 %v1871_v38 }
0x149e   :  { %1606 = vmatprep.subr.bf16.mxu1 %v1735_v0 }
0x156b   :  { %v933_v53 = vpop.f32.mrb[20].mxu1 }
0x156c   :  { %v939_v54 = vadd.f32 %v933_v53, %v117_v52  ;;  %v1576_v55 = vpop.f32.mrb[21].mxu1 }
0x156d   :  { %v936_v56 = vpop.f32.mrb[22].mxu1 }
0x156e   :  { %1699 = vtanh.f32 %v939_v54  ;;  %v1577_v57 = vpop.f32.mrb[23].mxu1  ;;  %v1368_v59 = vmul.f32 -1.442695, %v939_v54 }
0x1570   :  { %1701 = vpow2.f32 %v1368_v59 }
0x1578   :  { %v1700_v58 = vpop.eup %1699 }
0x1579   :  { %949 = vrot.lane.b32.xlu0 %v1700_v58, %s1738_s15 }
0x157a   :  { %v1702_v60 = vpop.eup %1701 }
0x157b   :  { %v943_v61 = vadd.f32 1.0, %v1702_v60 }
0x157d   :  { %1703 = vrcp.f32 %v943_v61 }
0x1587   :  { %v1704_v13 = vpop.eup %1703 }
0x1588   :  { %v947_v47 = vmul.f32 %v1704_v13, %v2035_v26 }
0x15eb   :  { %v950_v62 = vpop.permute.xlu0 %949 }
0x15ec   :  { %v952_v3 = vmul.f32 %v1704_v13, %v950_v62  ;;  %v125_v62 = vadd.f32 %v1890_v46, %v1842_v16 }
0x15ee   :  { %954 = vrot.lane.b32.xlu1 %v952_v3, %s1739_s2 }
0x1660   :  { %v955_v4 = vpop.permute.xlu1 %954 }
0x1661   :  { %v2073_v5 = vadd.f32 %v955_v4, %v947_v47 }
0x1663   :  { %1705 = vtanh.f32 %v2073_v5  ;;  %v958_v6 = vpack.c.bf16 %v2073_v5, %v2073_v5 }
0x1665   :  { %960 = vrot.lane.b32.xlu0 %v958_v6, %s1740_s0 }
0x166d   :  { %v1706_v7 = vpop.eup %1705 }
0x166e   :  { %1018 = vrot.lane.b32.xlu0 %v1706_v7, %s1738_s15 }
0x16d7   :  { %v961_v8 = vpop.permute.xlu0 %960 }
0x16d8   :  { %1583 = vmatmul.mubr.msk.bf16.vlgmr.msra.gmra.mrb[28].mxu0 %vm253_vm2, %v961_v8 }
0x16d9   :  { %1587 = vmatpush3.bf16.msra.mxu0 %v1780_v1  ;;  %1594 = vmatprep.mubr.msk.bf16.mxu0 %vm1736_vm0, %v1735_v0 }
0x16da   :  { %1588 = vmatprep.subr.bf16.mxu0 %v1735_v0 }
0x16dd   :  { %1589 = vmatpush3.bf16.msra.mxu0 %v1787_v2 }
0x16de   :  { %1590 = vmatprep.subr.bf16.mxu0 %v1735_v0 }
0x16e0   :  { %v1019_v45 = vpop.permute.xlu0 %1018 }
0x16e1   :  { %1591 = vmatpush3.bf16.msra.mxu0 %v1811_v9 }
0x16e2   :  { %1592 = vmatprep.subr.bf16.mxu0 %v1735_v0 }
0x16e5   :  { %1593 = vmatpush3.bf16.msra.mxu0 %v1820_v11 }
0x16e6   :  { %1618 = vmatprep.subr.bf16.mxu0 %v1735_v0 }
0x17ab   :  { %v999_v10 = vpop.f32.mrb[28].mxu0 }
0x17ac   :  { %1006 = vrot.lane.b32.xlu1 %v999_v10, %s1740_s0  ;;  %v1584_v12 = vpop.f32.mrb[29].mxu0 }
0x17ad   :  { %v1002_v14 = vpop.f32.mrb[30].mxu0 }
0x17ae   :  { %v1585_v18 = vpop.f32.mrb[31].mxu0 }
0x181e   :  { %v1007_v19 = vpop.permute.xlu1 %1006 }
0x181f   :  { %v1009_v20 = vadd.f32 %v1007_v19, %v939_v54 }
0x1821   :  { %v1370_v21 = vmul.f32 -1.442695, %v1009_v20 }
0x1823   :  { %1707 = vpow2.f32 %v1370_v21 }
0x182d   :  { %v1708_v17 = vpop.eup %1707 }
0x182e   :  { %v1013_v22 = vadd.f32 1.0, %v1708_v17 }
0x1830   :  { %1709 = vrcp.f32 %v1013_v22 }
0x183a   :  { %v1710_v24 = vpop.eup %1709 }
0x183b   :  { %v1021_v25 = vmul.f32 %v1710_v24, %v1019_v45 }
0x183d   :  { %1023 = vrot.lane.b32.xlu1 %v1021_v25, %s1739_s2 }
0x18af   :  { %v1024_v27 = vpop.permute.xlu1 %1023 }
0x18b0   :  { %1371 = vst.msk [vmem:[%s2210_s5 + $0x28] sm:$0xff] %vm253_vm2, %v1024_v27  ;;  %v1034_v28 = vsel %vm253_vm2, %v1024_v27, %v2073_v5 }
0x18b1   :  { %v1035_v29 = vpack.c.bf16 %v1034_v28, %v1034_v28 }
0x18b3   :  { %1595 = vmatmul.mubr.msk.bf16.vlgmr.msra.gmra.mrb[32].mxu0 %vm174_vm3, %v1035_v29 }
0x18b4   :  { %1619 = vmatpush3.bf16.msra.mxu0 %v1861_v34  ;;  %1622 = vmatprep.mubr.msk.bf16.mxu0 %vm1736_vm0, %v1735_v0 }
0x18b5   :  { %1620 = vmatprep.subr.bf16.mxu0 %v1735_v0 }
0x18b8   :  { %1621 = vmatpush3.bf16.msra.mxu0 %v1871_v38 }
0x1986   :  { %v1075_v31 = vpop.f32.mrb[32].mxu0 }
0x1987   :  { %v1081_v32 = vadd.f32 %v1075_v31, %v122_v30  ;;  %v1596_v33 = vpop.f32.mrb[33].mxu0 }
0x1988   :  { %v1078_v35 = vpop.f32.mrb[34].mxu0 }
0x1989   :  { %1711 = vtanh.f32 %v1081_v32  ;;  %v1597_v36 = vpop.f32.mrb[35].mxu0  ;;  %v1374_v34 = vmul.f32 -1.442695, %v1081_v32 }
0x198b   :  { %1713 = vpow2.f32 %v1374_v34 }
0x1993   :  { %v1712_v37 = vpop.eup %1711 }
0x1994   :  { %1091 = vrot.lane.b32.xlu0 %v1712_v37, %s1738_s15 }
0x1995   :  { %v1714_v39 = vpop.eup %1713 }
0x1996   :  { %v1085_v40 = vadd.f32 1.0, %v1714_v39 }
0x1998   :  { %1715 = vrcp.f32 %v1085_v40 }
0x19a2   :  { %v1716_v42 = vpop.eup %1715 }
0x19a3   :  { %v1089_v44 = vmul.f32 %v1716_v42, %v2073_v5 }
0x1a06   :  { %v1092_v15 = vpop.permute.xlu0 %1091 }
0x1a07   :  { %v1094_v38 = vmul.f32 %v1716_v42, %v1092_v15 }
0x1a09   :  { %1096 = vrot.lane.b32.xlu1 %v1094_v38, %s1739_s2 }
0x1a7b   :  { %v1097_v43 = vpop.permute.xlu1 %1096 }
0x1a7c   :  { %v2110_v49 = vadd.f32 %v1097_v43, %v1089_v44 }
0x1a7e   :  { %1717 = vtanh.f32 %v2110_v49  ;;  %v1100_v50 = vpack.c.bf16 %v2110_v49, %v2110_v49 }
0x1a80   :  { %1102 = vrot.lane.b32.xlu0 %v1100_v50, %s1740_s0 }
0x1a88   :  { %v1718_v51 = vpop.eup %1717 }
0x1a89   :  { %1160 = vrot.lane.b32.xlu0 %v1718_v51, %s1738_s15 }
0x1af2   :  { %v1103_v52 = vpop.permute.xlu0 %1102 }
0x1af3   :  { %1603 = vmatmul.mubr.msk.bf16.vlgmr.msra.gmra.mrb[24].mxu1 %vm253_vm2, %v1103_v52 }
0x1af4   :  { %1607 = vmatpush3.bf16.msra.mxu1 %v1780_v1  ;;  %1614 = vmatprep.mubr.msk.bf16.mxu1 %vm1736_vm0, %v1735_v0 }
0x1af5   :  { %1608 = vmatprep.subr.bf16.mxu1 %v1735_v0 }
0x1af8   :  { %1609 = vmatpush3.bf16.msra.mxu1 %v1787_v2 }
0x1af9   :  { %1610 = vmatprep.subr.bf16.mxu1 %v1735_v0 }
0x1afb   :  { %v1161_v61 = vpop.permute.xlu0 %1160 }
0x1afc   :  { %1611 = vmatpush3.bf16.msra.mxu1 %v1811_v9 }
0x1afd   :  { %1612 = vmatprep.subr.bf16.mxu1 %v1735_v0 }
0x1b00   :  { %1613 = vmatpush3.bf16.msra.mxu1 %v1820_v11 }
0x1bc6   :  { %v1141_v53 = vpop.f32.mrb[24].mxu1 }
0x1bc7   :  { %1148 = vrot.lane.b32.xlu1 %v1141_v53, %s1740_s0  ;;  %v1604_v54 = vpop.f32.mrb[25].mxu1 }
0x1bc8   :  { %v1144_v1 = vpop.f32.mrb[26].mxu1 }
0x1bc9   :  { %v1605_v55 = vpop.f32.mrb[27].mxu1 }
0x1c39   :  { %v1149_v56 = vpop.permute.xlu1 %1148 }
0x1c3a   :  { %v1151_v57 = vadd.f32 %v1149_v56, %v1081_v32 }
0x1c3c   :  { %v1376_v58 = vmul.f32 -1.442695, %v1151_v57 }
0x1c3e   :  { %1719 = vpow2.f32 %v1376_v58 }
0x1c48   :  { %v1720_v59 = vpop.eup %1719 }
0x1c49   :  { %v1155_v2 = vadd.f32 1.0, %v1720_v59 }
0x1c4b   :  { %1721 = vrcp.f32 %v1155_v2 }
0x1c55   :  { %v1722_v60 = vpop.eup %1721 }
0x1c56   :  { %v1163_v9 = vmul.f32 %v1722_v60, %v1161_v61 }
0x1c58   :  { %1165 = vrot.lane.b32.xlu1 %v1163_v9, %s1739_s2 }
0x1cca   :  { %v1166_v0 = vpop.permute.xlu1 %1165 }
0x1ccb   :  { %1377 = vst.msk [vmem:[%s2210_s5 + $0x30] sm:$0xff] %vm253_vm2, %v1166_v0  ;;  %v1176_v11 = vsel %vm253_vm2, %v1166_v0, %v2110_v49 }
0x1ccc   :  { %v1177_v13 = vpack.c.bf16 %v1176_v11, %v1176_v11 }
0x1cce   :  { %1615 = vmatmul.mubr.msk.bf16.vlgmr.msra.gmra.mrb[28].mxu1 %vm174_vm3, %v1177_v13 }
0x1da1   :  { %v1217_v3 = vpop.f32.mrb[28].mxu1 }
0x1da2   :  { %v1223_v47 = vadd.f32 %v1217_v3, %v125_v62  ;;  %v1616_v4 = vpop.f32.mrb[29].mxu1 }
0x1da3   :  { %v1220_v6 = vpop.f32.mrb[30].mxu1 }
0x1da4   :  { %1723 = vtanh.f32 %v1223_v47  ;;  %v1617_v7 = vpop.f32.mrb[31].mxu1  ;;  %v1380_v10 = vmul.f32 -1.442695, %v1223_v47 }
0x1da6   :  { %1725 = vpow2.f32 %v1380_v10 }
0x1dae   :  { %v1724_v8 = vpop.eup %1723 }
0x1daf   :  { %1233 = vrot.lane.b32.xlu0 %v1724_v8, %s1738_s15 }
0x1db0   :  { %v1726_v12 = vpop.eup %1725 }
0x1db1   :  { %v1227_v14 = vadd.f32 1.0, %v1726_v12 }
0x1db3   :  { %1727 = vrcp.f32 %v1227_v14 }
0x1dbd   :  { %v1728_v18 = vpop.eup %1727 }
0x1dbe   :  { %v1231_v16 = vmul.f32 %v1728_v18, %v2110_v49 }
0x1e21   :  { %v1234_v19 = vpop.permute.xlu0 %1233 }
0x1e22   :  { %v1236_v20 = vmul.f32 %v1728_v18, %v1234_v19 }
0x1e24   :  { %1238 = vrot.lane.b32.xlu1 %v1236_v20, %s1739_s2 }
0x1e96   :  { %v1239_v46 = vpop.permute.xlu1 %1238 }
0x1e97   :  { %v1241_v21 = vadd.f32 %v1239_v46, %v1231_v16 }
0x1e99   :  { %1729 = vtanh.f32 %v1241_v21  ;;  %v1242_v17 = vpack.c.bf16 %v1241_v21, %v1241_v21 }
0x1e9b   :  { %1244 = vrot.lane.b32.xlu0 %v1242_v17, %s1740_s0 }
0x1ea3   :  { %v1730_v22 = vpop.eup %1729 }
0x1ea4   :  { %1302 = vrot.lane.b32.xlu0 %v1730_v22, %s1738_s15 }
0x1ea8   :  { %1313 = vrot.lane.b32.xlu0 %v1241_v21, %s1740_s0 }
0x1eac   :  { %461 = vrot.lane.b32.xlu0 %v1921_v23, %s1740_s0 }
0x1eb0   :  { %745 = vrot.lane.b32.xlu0 %v1997_v48, %s1740_s0 }
0x1eb4   :  { %1029 = vrot.lane.b32.xlu0 %v2073_v5, %s1740_s0 }
0x1f0d   :  { %v1245_v24 = vpop.permute.xlu0 %1244 }
0x1f0e   :  { %1623 = vmatmul.mubr.msk.bf16.vlgmr.msra.gmra.mrb[36].mxu0 %vm253_vm2, %v1245_v24 }
0x1f16   :  { %v1303_v45 = vpop.permute.xlu0 %1302 }
0x1f1a   :  { %v1314_v25 = vpop.permute.xlu0 %1313 }
0x1f1b   :  { %1384 = vst.msk [vmem:[%s2211_s6 + $0x38] sm:$0xff] %vm253_vm2, %v1314_v25 }
0x1f1c   :  { %1386 = vst.msk [vmem:[%s2211_s6 + $0x38] sm:$0xff] %vm253_vm2, %v1314_v25 }
0x1f1e   :  { %v462_v23 = vpop.permute.xlu0 %461 }
0x1f1f   :  { %1348 = vst.msk [vmem:[%s2211_s6 + $0x8] sm:$0xff] %vm253_vm2, %v462_v23 }
0x1f22   :  { %v746_v48 = vpop.permute.xlu0 %745 }
0x1f23   :  { %1360 = vst.msk [vmem:[%s2211_s6 + $0x18] sm:$0xff] %vm253_vm2, %v746_v48 }
0x1f26   :  { %v1030_v5 = vpop.permute.xlu0 %1029 }
0x1f27   :  { %1372 = vst.msk [vmem:[%s2211_s6 + $0x28] sm:$0xff] %vm253_vm2, %v1030_v5 }
0x1fe1   :  { %v1283_v27 = vpop.f32.mrb[36].mxu0 }
0x1fe2   :  { %1290 = vrot.lane.b32.xlu1 %v1283_v27, %s1740_s0  ;;  %v1624_v28 = vpop.f32.mrb[37].mxu0 }
0x1fe3   :  { %v1286_v29 = vpop.f32.mrb[38].mxu0 }
0x1fe4   :  { %v1625_v30 = vpop.f32.mrb[39].mxu0 }
0x1fe6   :  { %320 = vrot.lane.b32.xlu1 %v1879_v41, %s1740_s0 }
0x1fea   :  { %603 = vrot.lane.b32.xlu1 %v1959_v63, %s1740_s0 }
0x1fee   :  { %887 = vrot.lane.b32.xlu1 %v2035_v26, %s1740_s0 }
0x2054   :  { %v1291_v31 = vpop.permute.xlu1 %1290 }
0x2055   :  { %v1293_v32 = vadd.f32 %v1291_v31, %v1223_v47 }
0x2057   :  { %v1382_v33 = vmul.f32 -1.442695, %v1293_v32 }
0x2058   :  { %v321_v35 = vpop.permute.xlu1 %320 }
0x2059   :  { %1731 = vpow2.f32 %v1382_v33  ;;  %323 = vst.msk [vmem:[%s2211_s6] sm:$0xff] %vm253_vm2, %v321_v35 }
0x205c   :  { %v604_v36 = vpop.permute.xlu1 %603 }
0x205d   :  { %1354 = vst.msk [vmem:[%s2211_s6 + $0x10] sm:$0xff] %vm253_vm2, %v604_v36 }
0x2060   :  { %v888_v41 = vpop.permute.xlu1 %887 }
0x2061   :  { %1366 = vst.msk [vmem:[%s2211_s6 + $0x20] sm:$0xff] %vm253_vm2, %v888_v41 }
0x2063   :  { %v1732_v63 = vpop.eup %1731 }
0x2064   :  { %v1297_v26 = vadd.f32 1.0, %v1732_v63 }
0x2066   :  { %1733 = vrcp.f32 %v1297_v26 }
0x2070   :  { %v1734_v37 = vpop.eup %1733 }
0x2071   :  { %v1305_v34 = vmul.f32 %v1734_v37, %v1303_v45 }
0x2073   :  { %1307 = vrot.lane.b32.xlu1 %v1305_v34, %s1739_s2 }
0x2077   :  { %1171 = vrot.lane.b32.xlu1 %v2110_v49, %s1740_s0 }
0x20e5   :  { %v1308_v39 = vpop.permute.xlu1 %1307 }
0x20e6   :  { %1383 = vst.msk [vmem:[%s2210_s5 + $0x38] sm:$0xff] %vm253_vm2, %v1308_v39 }
0x20e7   :  { %1385 = vst.msk [vmem:[%s2210_s5 + $0x38] sm:$0xff] %vm253_vm2, %v1308_v39 }
0x20e9   :  { %v1172_v40 = vpop.permute.xlu1 %1171 }
0x20ea   :  { %1378 = vst.msk [vmem:[%s2211_s6 + $0x30] sm:$0xff] %vm253_vm2, %v1172_v40 }

</bundles_post_ra>
